<compile_context>
chip_gen: v7x
topology: tpu7x:2x2x1
jax: 0.10.0
libtpu: 0.0.40
codegen_flags: <defaults>
</compile_context>

<pallas_src>
import functools

import numpy as np
import jax
import jax.numpy as jnp
from jax import lax
from jax.experimental import pallas as pl
from jax.experimental.pallas import tpu as pltpu


# ----------------------------------------------------------------------------
# Pallas kernel: one block of BB batch elements, fully flattened to 2-D.
# ----------------------------------------------------------------------------
def tenet_kernel(xf_ref, A_ref, Mext_ref, W1_ref, W2_ref, W3T_ref, out_ref,
                 *, H1p, H2p):
    f32 = jnp.float32
    xf = xf_ref[...]                       # (BBn, window+1)  [last col == 1]
    A = A_ref[...]                         # (BBn, BBn) block-diagonal adjacency

    # conv1/2/3 + bias + highway (+/-) + ones column, all in one matmul.
    xc = jnp.maximum(
        jnp.dot(xf, Mext_ref[...], preferred_element_type=f32), 0.0)   # (BBn, Dc)

    # --- GNN layer 1:  relu(A @ (xc @ Wrel1) + xc @ Wroot1 + b1) -------------
    hp1 = jnp.dot(xc, W1_ref[...], preferred_element_type=f32)          # (BBn, 2*H1p)
    h1 = jnp.maximum(
        jnp.dot(A, hp1[:, :H1p], preferred_element_type=f32) + hp1[:, H1p:], 0.0)

    # --- GNN layer 2 ---------------------------------------------------------
    hp2 = jnp.dot(h1, W2_ref[...], preferred_element_type=f32)          # (BBn, 2*H2p)
    h2 = jnp.maximum(
        jnp.dot(A, hp2[:, :H2p], preferred_element_type=f32) + hp2[:, H2p:], 0.0)

    # --- GNN layer 3 + highway, computed transposed so the result is a
    #     lane-dense (1, BBn) row.  W3T is (2, H2p):
    #       row 0 -> wrel3,  row 1 -> wroot3 + b3 + (+1/-1) highway passthrough.
    hp3T = lax.dot_general(W3T_ref[...], h2, (((1,), (1,)), ((), ())),
                           preferred_element_type=f32)                  # (2, BBn)
    # (A @ hrel3)^T  ==  hrel3^T @ A^T  (contract both operands on dim 1)
    aggT = lax.dot_general(hp3T[0:1, :], A, (((1,), (1,)), ((), ())),
                           preferred_element_type=f32)                  # (1, BBn)
    out_ref[0] = aggT + hp3T[1:2, :]                                    # (1, BBn)


# ----------------------------------------------------------------------------
# Wrapper
# ----------------------------------------------------------------------------
def tenet_forward(x, A0, packed, *, BB=32):
    """x: (B, window, n_e) f32;  A0: (n_e, n_e) column-normalized adjacency.
    Returns (B, n_e) f32."""
    Mext, W1, W2, W3T = packed
    B, window, n_e = x.shape
    Tw, Dc = Mext.shape
    assert Tw == window + 1
    H1p = W1.shape[1] // 2
    H2p = W2.shape[1] // 2

    BBn = BB * n_e
    assert BBn % 8 == 0, "choose BB so that BB*n_e is a multiple of 8"
    nblocks = pl.cdiv(B, BB)
    B_pad = nblocks * BB

    # (B, window, n_e) -> (B*n_e, window) rows, append the constant-1 column.
    x_t = jnp.transpose(x, (0, 2, 1)).reshape(B * n_e, window)
    xf = jnp.concatenate([x_t, jnp.ones((B * n_e, 1), x.dtype)], axis=1)
    if B_pad > B:
        xf = jnp.pad(xf, ((0, (B_pad - B) * n_e), (0, 0)))

    # Shared adjacency, replicated block-diagonally over the BB batches/step.
    A_bd = jnp.kron(jnp.eye(BB, dtype=jnp.float32), A0.astype(jnp.float32))

    kernel = functools.partial(tenet_kernel, H1p=H1p, H2p=H2p)
    out = pl.pallas_call(
        kernel,
        out_shape=jax.ShapeDtypeStruct((nblocks, 1, BBn), jnp.float32),
        grid_spec=pltpu.PrefetchScalarGridSpec(
            num_scalar_prefetch=0,
            grid=(nblocks,),
            in_specs=[
                pl.BlockSpec((BBn, Tw), lambda i: (i, 0)),      # xf (per block)
                pl.BlockSpec((BBn, BBn), lambda i: (0, 0)),     # A (invariant)
                pl.BlockSpec(Mext.shape, lambda i: (0, 0)),     # fused conv+hw
                pl.BlockSpec(W1.shape, lambda i: (0, 0)),       # gnn1 packed
                pl.BlockSpec(W2.shape, lambda i: (0, 0)),       # gnn2 packed
                pl.BlockSpec(W3T.shape, lambda i: (0, 0)),      # gnn3 packed^T
            ],
            out_specs=pl.BlockSpec((1, 1, BBn), lambda i: (i, 0, 0)),
        ),
        compiler_params=pltpu.CompilerParams(
            dimension_semantics=("parallel",)),
    )(xf, A_bd, Mext, W1, W2, W3T)

    return out.reshape(B_pad, n_e)[:B]                       # (B, n_e)


# ----------------------------------------------------------------------------
# Host-side weight packing (deterministic, pure numpy)
# ----------------------------------------------------------------------------
def _round_up(x, m):
    return ((x + m - 1) // m) * m


def pack_tenet_params(conv_ws, conv_bs,
                      wrel1, wroot1, b1, wrel2, wroot2, b2,
                      wrel3, wroot3, b3, whw, bhw,
                      *, window, hw, H1p=128, H2p=128):
    """Pack everything into 4 arrays:
         Mext (window+1, Dc) : Toeplitz convs + bias row + (+z,-z) highway cols
                               + ones column
         W1   (Dc, 2*H1p)    : [Wrel1 | Wroot1 (+b1 via ones row, passthrough)]
         W2   (H1p, 2*H2p)   : [Wrel2 | Wroot2 (+b2, passthrough)]
         W3T  (2, H2p)       : [wrel3 ; wroot3 + b3 + z reconstruction]
    """
    hid1, hid2 = wrel1.shape[1], wrel2.shape[1]
    assert hid1 <= H1p - 3 and hid2 <= H2p - 3
    assert hw <= window
    d = sum(w.shape[0] * (window - w.shape[1] + 1) for w in conv_ws)
    Dc = max(128, _round_up(d + 3, 128))
    Tw = window + 1

    ZP0, ZM0, ONE0 = Dc - 3, Dc - 2, Dc - 1        # columns in conv space
    ZP1, ZM1, ONE1 = H1p - 3, H1p - 2, H1p - 1     # columns in h1 space
    ZP2, ZM2, ONE2 = H2p - 3, H2p - 2, H2p - 1     # columns in h2 space

    # --- fused conv / highway matrix -----------------------------------------
    Mext = np.zeros((Tw, Dc), np.float32)
    col = 0
    for w, b in zip(conv_ws, conv_bs):
        w = np.asarray(w, np.float32)
        b = np.asarray(b, np.float32)
        C, k = w.shape
        T = window - k + 1
        for c in range(C):
            for t in range(T):
                Mext[t:t + k, col + c * T + t] = w[c]      # channel-major
        Mext[window, col:col + C * T] = np.repeat(b, T)    # conv bias (ones row)
        col += C * T
    assert col == d

    hwcol = np.zeros((Tw,), np.float32)
    hwcol[window - hw:window] = np.asarray(whw, np.float32)[:, 0]
    hwcol[window] = float(np.asarray(bhw).reshape(-1)[0])  # highway bias
    Mext[:, ZP0] = hwcol                                   # +z  -> relu(z)
    Mext[:, ZM0] = -hwcol                                  # -z  -> relu(-z)
    Mext[window, ONE0] = 1.0                               # ones column

    # --- GNN layer 1 ----------------------------------------------------------
    W1 = np.zeros((Dc, 2 * H1p), np.float32)
    W1[:d, :hid1] = np.asarray(wrel1, np.float32)
    W1[:d, H1p:H1p + hid1] = np.asarray(wroot1, np.float32)
    W1[ONE0, H1p:H1p + hid1] = np.asarray(b1, np.float32).reshape(-1)
    W1[ZP0, H1p + ZP1] = 1.0
    W1[ZM0, H1p + ZM1] = 1.0
    W1[ONE0, H1p + ONE1] = 1.0

    # --- GNN layer 2 ----------------------------------------------------------
    W2 = np.zeros((H1p, 2 * H2p), np.float32)
    W2[:hid1, :hid2] = np.asarray(wrel2, np.float32)
    W2[:hid1, H2p:H2p + hid2] = np.asarray(wroot2, np.float32)
    W2[ONE1, H2p:H2p + hid2] = np.asarray(b2, np.float32).reshape(-1)
    W2[ZP1, H2p + ZP2] = 1.0
    W2[ZM1, H2p + ZM2] = 1.0
    W2[ONE1, H2p + ONE2] = 1.0

    # --- GNN layer 3 (stored transposed) + bias + highway reconstruction -----
    W3T = np.zeros((2, H2p), np.float32)
    W3T[0, :hid2] = np.asarray(wrel3, np.float32)[:, 0]
    W3T[1, :hid2] = np.asarray(wroot3, np.float32)[:, 0]
    W3T[1, ONE2] = float(np.asarray(b3).reshape(-1)[0])
    W3T[1, ZP2] = 1.0      # + relu(z)
    W3T[1, ZM2] = -1.0     # - relu(-z)   =>  + z

    return (jnp.asarray(Mext), jnp.asarray(W1), jnp.asarray(W2),
            jnp.asarray(W3T))


# ----------------------------------------------------------------------------
# Pure-JAX reference (independent of the packing trick) for validation
# ----------------------------------------------------------------------------
def reference_forward(x, A, conv_ws, conv_bs, gnn_params, whw, bhw, hw):
    B, window, n_e = x.shape
    xp = jnp.transpose(x, (0, 2, 1))                      # (B, n_e, window)

    outs = []
    for w, b in zip(conv_ws, conv_bs):
        C, k = w.shape
        T = window - k + 1
        cols = [jnp.einsum('bnk,ck->bnc', xp[..., t:t + k], jnp.asarray(w))
                for t in range(T)]
        o = jnp.stack(cols, axis=-1) + jnp.asarray(b)[None, None, :, None]
        outs.append(o.reshape(B, n_e, C * T))             # channel-major
    xc = jax.nn.relu(jnp.concatenate(outs, axis=2))

    h = xc
    for i, (wrel, wroot, bb) in enumerate(gnn_params):
        agg = jnp.einsum('bij,bjd->bid', A, h)
        h_new = agg @ wrel + h @ wroot + bb
        h = jax.nn.relu(h_new) if i < 2 else h_new
    x3 = h[..., 0]                                        # (B, n_e)

    z = jnp.einsum('bnt,to->bno', xp[:, :, -hw:], whw)[..., 0] + bhw[0, 0]
    return x3 + z


# ----------------------------------------------------------------------------
if __name__ == "__main__":
    # config consistent with the module's forward (GNN decoder path)
    B, window, n_e = 64, 16, 8
    channel_size = 4
    k_size = [3, 5, 7]
    hid1, hid2 = 16, 16
    hw = 4
    BB = 32                                               # 32 * n_e = 256 rows
    d = (len(k_size) * window - sum(k_size) + len(k_size)) * channel_size  # 144

    key = jax.random.PRNGKey(0)
    ks = jax.random.split(key, 20)

    # conv weights (Conv2d(1, C, (1, k)) -> effectively (C, k) filters)
    conv_ws = [np.asarray(jax.random.normal(ks[i], (channel_size, k)) * 0.1,
                          dtype=np.float32) for i, k in enumerate(k_size)]
    conv_bs = [np.asarray(jax.random.normal(ks[3 + i], (channel_size,)) * 0.1,
                          dtype=np.float32) for i in range(3)]

    # DenseGraphConv params (stored already transposed for right-multiply)
    def lin(kw, i, o):
        return jax.random.normal(kw, (i, o), dtype=jnp.float32) * 0.1

    wrel1, wroot1 = lin(ks[6], d, hid1), lin(ks[7], d, hid1)
    b1 = jax.random.normal(ks[8], (1, hid1), dtype=jnp.float32) * 0.1
    wrel2, wroot2 = lin(ks[9], hid1, hid2), lin(ks[10], hid1, hid2)
    b2 = jax.random.normal(ks[11], (1, hid2), dtype=jnp.float32) * 0.1
    wrel3, wroot3 = lin(ks[12], hid2, 1), lin(ks[13], hid2, 1)
    b3 = jax.random.normal(ks[14], (1, 1), dtype=jnp.float32) * 0.1

    # highway Linear(hw, 1)
    whw = jax.random.normal(ks[15], (hw, 1), dtype=jnp.float32) * 0.1
    bhw = jnp.full((1, 1), 0.05, dtype=jnp.float32)

    # adjacency: positive, column-normalized (A / sum(A, 0)); shared over batch
    A0 = jnp.abs(jax.random.uniform(ks[16], (n_e, n_e))) + 0.1
    A0 = (A0 / jnp.sum(A0, axis=0, keepdims=True)).astype(jnp.float32)

    # input
    x = jax.random.normal(ks[17], (B, window, n_e), dtype=jnp.float32)

    packed = pack_tenet_params(
        conv_ws, conv_bs,
        np.asarray(wrel1), np.asarray(wroot1), np.asarray(b1),
        np.asarray(wrel2), np.asarray(wroot2), np.asarray(b2),
        np.asarray(wrel3), np.asarray(wroot3), np.asarray(b3),
        np.asarray(whw), np.asarray(bhw),
        window=window, hw=hw)

    out = tenet_forward(x, A0, packed, BB=BB)
    out = jax.block_until_ready(out)

    A_batched = jnp.broadcast_to(A0[None], (B, n_e, n_e)).astype(jnp.float32)
    ref = reference_forward(
        x, A_batched, conv_ws, conv_bs,
        [(wrel1, wroot1, b1), (wrel2, wroot2, b2), (wrel3, wroot3, b3)],
        whw, bhw, hw)

    err = float(jnp.max(jnp.abs(out - ref)))
    assert out.shape == (B, n_e)
    assert jnp.allclose(out, ref, atol=5e-3, rtol=5e-3), (
        f"mismatch: max abs err {err}")
    print("KERNEL_OK")
</pallas_src>

<mosaic_0001>
module attributes {stable_mosaic.version = 11 : i64} {
  func.func @tenet_kernel(%arg0: i32, %arg1: memref<256x17xf32, #tpu.memory_space<vmem>>, %arg2: memref<256x256xf32, #tpu.memory_space<vmem>>, %arg3: memref<17x256xf32, #tpu.memory_space<vmem>>, %arg4: memref<256x256xf32, #tpu.memory_space<vmem>>, %arg5: memref<128x256xf32, #tpu.memory_space<vmem>>, %arg6: memref<2x128xf32, #tpu.memory_space<vmem>>, %arg7: memref<1x1x256xf32, #tpu.memory_space<vmem>>) attributes {dimension_semantics = [#tpu.dimension_semantics<parallel>], iteration_bounds = array<i64: 2>, scalar_prefetch = 0 : i64, scratch_operands = 0 : i64, tpu.core_type = #tpu.core_type<tc>, window_params = [{transform_indices = @transform_0, window_bounds = array<i64: 256, 17>}, {pipeline_mode = #tpu.pipeline_mode<synchronous>, transform_indices = @transform_1, window_bounds = array<i64: 256, 256>}, {pipeline_mode = #tpu.pipeline_mode<synchronous>, transform_indices = @transform_2, window_bounds = array<i64: 17, 256>}, {pipeline_mode = #tpu.pipeline_mode<synchronous>, transform_indices = @transform_3, window_bounds = array<i64: 256, 256>}, {pipeline_mode = #tpu.pipeline_mode<synchronous>, transform_indices = @transform_4, window_bounds = array<i64: 128, 256>}, {pipeline_mode = #tpu.pipeline_mode<synchronous>, transform_indices = @transform_5, window_bounds = array<i64: 2, 128>}, {transform_indices = @transform_6, window_bounds = array<i64: 1, 1, 256>}]} {
    %c0 = arith.constant 0 : index
    %c0_0 = arith.constant 0 : index
    %0 = vector.load %arg1[%c0, %c0_0] : memref<256x17xf32, #tpu.memory_space<vmem>>, vector<256x17xf32>
    %c0_1 = arith.constant 0 : index
    %c0_2 = arith.constant 0 : index
    %1 = vector.load %arg2[%c0_1, %c0_2] : memref<256x256xf32, #tpu.memory_space<vmem>>, vector<256x256xf32>
    %c0_3 = arith.constant 0 : index
    %c0_4 = arith.constant 0 : index
    %2 = vector.load %arg3[%c0_3, %c0_4] : memref<17x256xf32, #tpu.memory_space<vmem>>, vector<17x256xf32>
    %cst = arith.constant dense<0.000000e+00> : vector<256x256xf32>
    %3 = tpu.matmul %0, %2, %cst {dimension_numbers = #tpu.dot_dimension_numbers<[1], [0], [0], [1], [0, 0, 1, 1], [], []>} : vector<256x17xf32>, vector<17x256xf32>, vector<256x256xf32> -> vector<256x256xf32>
    %cst_5 = arith.constant 0.000000e+00 : f32
    %4 = vector.broadcast %cst_5 : f32 to vector<256x256xf32>
    %5 = arith.maximumf %3, %4 : vector<256x256xf32>
    %c0_6 = arith.constant 0 : index
    %c0_7 = arith.constant 0 : index
    %6 = vector.load %arg4[%c0_6, %c0_7] : memref<256x256xf32, #tpu.memory_space<vmem>>, vector<256x256xf32>
    %cst_8 = arith.constant dense<0.000000e+00> : vector<256x256xf32>
    %7 = tpu.matmul %5, %6, %cst_8 {dimension_numbers = #tpu.dot_dimension_numbers<[1], [0], [0], [1], [0, 0, 1, 1], [], []>} : vector<256x256xf32>, vector<256x256xf32>, vector<256x256xf32> -> vector<256x256xf32>
    %8 = vector.extract_strided_slice %7 {offsets = [0, 0], sizes = [256, 128], strides = [1, 1]} : vector<256x256xf32> to vector<256x128xf32>
    %cst_9 = arith.constant dense<0.000000e+00> : vector<256x128xf32>
    %9 = tpu.matmul %1, %8, %cst_9 {dimension_numbers = #tpu.dot_dimension_numbers<[1], [0], [0], [1], [0, 0, 1, 1], [], []>} : vector<256x256xf32>, vector<256x128xf32>, vector<256x128xf32> -> vector<256x128xf32>
    %10 = vector.extract_strided_slice %7 {offsets = [0, 128], sizes = [256, 128], strides = [1, 1]} : vector<256x256xf32> to vector<256x128xf32>
    %11 = arith.addf %9, %10 : vector<256x128xf32>
    %cst_10 = arith.constant 0.000000e+00 : f32
    %12 = vector.broadcast %cst_10 : f32 to vector<256x128xf32>
    %13 = arith.maximumf %11, %12 : vector<256x128xf32>
    %c0_11 = arith.constant 0 : index
    %c0_12 = arith.constant 0 : index
    %14 = vector.load %arg5[%c0_11, %c0_12] : memref<128x256xf32, #tpu.memory_space<vmem>>, vector<128x256xf32>
    %cst_13 = arith.constant dense<0.000000e+00> : vector<256x256xf32>
    %15 = tpu.matmul %13, %14, %cst_13 {dimension_numbers = #tpu.dot_dimension_numbers<[1], [0], [0], [1], [0, 0, 1, 1], [], []>} : vector<256x128xf32>, vector<128x256xf32>, vector<256x256xf32> -> vector<256x256xf32>
    %16 = vector.extract_strided_slice %15 {offsets = [0, 0], sizes = [256, 128], strides = [1, 1]} : vector<256x256xf32> to vector<256x128xf32>
    %cst_14 = arith.constant dense<0.000000e+00> : vector<256x128xf32>
    %17 = tpu.matmul %1, %16, %cst_14 {dimension_numbers = #tpu.dot_dimension_numbers<[1], [0], [0], [1], [0, 0, 1, 1], [], []>} : vector<256x256xf32>, vector<256x128xf32>, vector<256x128xf32> -> vector<256x128xf32>
    %18 = vector.extract_strided_slice %15 {offsets = [0, 128], sizes = [256, 128], strides = [1, 1]} : vector<256x256xf32> to vector<256x128xf32>
    %19 = arith.addf %17, %18 : vector<256x128xf32>
    %cst_15 = arith.constant 0.000000e+00 : f32
    %20 = vector.broadcast %cst_15 : f32 to vector<256x128xf32>
    %21 = arith.maximumf %19, %20 : vector<256x128xf32>
    %c0_16 = arith.constant 0 : index
    %c0_17 = arith.constant 0 : index
    %22 = vector.load %arg6[%c0_16, %c0_17] : memref<2x128xf32, #tpu.memory_space<vmem>>, vector<2x128xf32>
    %cst_18 = arith.constant dense<0.000000e+00> : vector<2x256xf32>
    %23 = tpu.matmul %22, %21, %cst_18 {dimension_numbers = #tpu.dot_dimension_numbers<[1], [1], [0], [0], [0, 0, 1, 0], [], []>} : vector<2x128xf32>, vector<256x128xf32>, vector<2x256xf32> -> vector<2x256xf32>
    %24 = vector.extract_strided_slice %23 {offsets = [0, 0], sizes = [1, 256], strides = [1, 1]} : vector<2x256xf32> to vector<1x256xf32>
    %cst_19 = arith.constant dense<0.000000e+00> : vector<1x256xf32>
    %25 = tpu.matmul %24, %1, %cst_19 {dimension_numbers = #tpu.dot_dimension_numbers<[1], [1], [0], [0], [0, 0, 1, 0], [], []>} : vector<1x256xf32>, vector<256x256xf32>, vector<1x256xf32> -> vector<1x256xf32>
    %26 = vector.extract_strided_slice %23 {offsets = [1, 0], sizes = [1, 256], strides = [1, 1]} : vector<2x256xf32> to vector<1x256xf32>
    %27 = arith.addf %25, %26 : vector<1x256xf32>
    %c0_20 = arith.constant 0 : index
    %c0_21 = arith.constant 0 : index
    %c0_22 = arith.constant 0 : index
    %28 = vector.load %arg7[%c0_20, %c0_21, %c0_22] : memref<1x1x256xf32, #tpu.memory_space<vmem>>, vector<1x1x256xf32>
    %29 = vector.shape_cast %28 : vector<1x1x256xf32> to vector<1x256xf32>
    %30 = vector.shape_cast %27 : vector<1x256xf32> to vector<1x1x256xf32>
    tpu.vector_store %arg7[%c0_20, %c0_21, %c0_22], %30 {strides = array<i32>} : memref<1x1x256xf32, #tpu.memory_space<vmem>>, vector<1x1x256xf32>,
    return
  }
  func.func @transform_0(%arg0: i32) -> (i32, i32) {
    %c0_i32 = arith.constant 0 : i32
    %c0_i32_0 = arith.constant 0 : i32
    return %arg0, %c0_i32 : i32, i32
  }
  func.func @transform_1(%arg0: i32) -> (i32, i32) {
    %c0_i32 = arith.constant 0 : i32
    %c0_i32_0 = arith.constant 0 : i32
    %c0_i32_1 = arith.constant 0 : i32
    return %c0_i32, %c0_i32_0 : i32, i32
  }
  func.func @transform_2(%arg0: i32) -> (i32, i32) {
    %c0_i32 = arith.constant 0 : i32
    %c0_i32_0 = arith.constant 0 : i32
    %c0_i32_1 = arith.constant 0 : i32
    return %c0_i32, %c0_i32_0 : i32, i32
  }
  func.func @transform_3(%arg0: i32) -> (i32, i32) {
    %c0_i32 = arith.constant 0 : i32
    %c0_i32_0 = arith.constant 0 : i32
    %c0_i32_1 = arith.constant 0 : i32
    return %c0_i32, %c0_i32_0 : i32, i32
  }
  func.func @transform_4(%arg0: i32) -> (i32, i32) {
    %c0_i32 = arith.constant 0 : i32
    %c0_i32_0 = arith.constant 0 : i32
    %c0_i32_1 = arith.constant 0 : i32
    return %c0_i32, %c0_i32_0 : i32, i32
  }
  func.func @transform_5(%arg0: i32) -> (i32, i32) {
    %c0_i32 = arith.constant 0 : i32
    %c0_i32_0 = arith.constant 0 : i32
    %c0_i32_1 = arith.constant 0 : i32
    return %c0_i32, %c0_i32_0 : i32, i32
  }
  func.func @transform_6(%arg0: i32) -> (i32, i32, i32) {
    %c0_i32 = arith.constant 0 : i32
    %c0_i32_0 = arith.constant 0 : i32
    %c0_i32_1 = arith.constant 0 : i32
    return %arg0, %c0_i32, %c0_i32_0 : i32, i32, i32
  }
}

</mosaic_0001>

<bundles_post_ra>
// kernel: tpu_custom_call.1
= control target key start
LH: loop header
LB: loop body
LE: loop exit
PB: predicated region body
PF: predicated region fallthrough
CT: control target
= control target key end

     0   :  { %11 = vsyncpa [#allocation3], 0  ;;  %s4196_s0 = inlined_call_operand.vmem [shape: f32[512,17], index: 0, kind: input, shape index: {}]   ;;  %s4197_s1 = inlined_call_operand.vmem [shape: f32[256,256], index: 1, kind: input, shape index: {}]   ;;  %s4198_s2 = inlined_call_operand.vmem [shape: f32[17,256], index: 2, kind: input, shape index: {}]   ;;  %s4199_s3 = inlined_call_operand.hbm [shape: f32[256,256], index: 3, kind: input, shape index: {}]   ;;  %s4200_s4 = inlined_call_operand.hbm [shape: f32[128,256], index: 4, kind: input, shape index: {}]   ;;  %s4201_s5 = inlined_call_operand.vmem [shape: f32[2,128], index: 5, kind: input, shape index: {}]   ;;  %s4202_s6 = inlined_call_operand.hbm [shape: f32[2,1,256], index: 6, kind: output, shape index: {}]  }
   0x1   :  { %12 = vsyncpa [#allocation6], 0 }
   0x2   :  { %13 = vsyncpa [#allocation4], 0 }
   0x3   :  { %15 = vsyncpa [#allocation4 + $0x1], 0  ;;  %s2882_s21 = smov 0   ;;  %s2884_s22 = smov 0  }
   0x4   :  { %s2886_s23 = smov 0   ;;  %s2888_s24 = smov 0  }
   0x5 LB: > { %s2903_s25 = sadd.s32 4294967295, %s2837_s24   ;;  %s2201_s26 = sadd.s32 4294967294, %s2837_s24   ;;  %s2837_s24 = sphi %s2888_s24, %s4361_s24   ;;  %s2833_s23 = sphi %s2886_s23, %s4360_s23   ;;  %s2829_s22 = sphi %s2884_s22, %s4359_s22   ;;  %s2825_s21 = sphi %s2882_s21, %s4358_s21  }
   0x6   : > { %s2907_s27 = sadd.s32 1, %s2837_s24   ;;  %s159_s28 = sadd.s32 1, %s2833_s23 }
   0x7   : > { %s156_s29 = ssub.s32 %s2837_s24, %s2907_s27  ;;  %p169_p0 = scmp.ne.s32.totalorder %s2833_s23, %s2829_s22 }
   0x8   : > { %p157_p1 = scmp.eq.s32.totalorder %s156_s29, 0  ;;  %p170_p2 = scmp.eq.s32.totalorder %s2903_s25, 1 }
   0x9   : > { %p175_p3 = scmp.ne.s32.totalorder %s2829_s22, %s2825_s21  ;;  %p176_p4 = scmp.eq.s32.totalorder %s2201_s26, 1 }
   0xa   : > { %s2918_s30 = scalar_select %p157_p1, %s2833_s23, %s159_s28  }
   0xb   : > { %p2920_p5 = por %p170_p2, %p169_p0  ;;  %p2924_p6 = por %p176_p4, %p175_p3 }
   0xc   : > { %p2202_p7 = scmp.ge.s32.totalorder %s2837_s24, 1  ;;  %p183_p8 = scmp.lt.s32.totalorder %s2837_s24, 3 }
   0xd   : > { %s4255_s7 = scalar_select %p2920_p5, 1, 0 }
   0xe   : > { %s4256_s8 = scalar_select %p2924_p6, 1, 0 }
   0xf   : > { %p4203_p9 = scmp.eq.s32.totalorder %s2903_s25, 0  ;;  %p2931_p10 = pnand %p2202_p7, %p183_p8 }
  0x10   : > { %s2839_s10 = smov [#allocation2]   ;;  %s2840_s13 = smov [#allocation5]  }
  0x11   : > { %s4257_s9 = scalar_select %p2931_p10, 1, 0 }
  0x12   : > { %s201_s11 = sshll.u32 %s2839_s10, 4  ;;  %p2592_p11 = pneg %p2931_p10  ;;  %s202_s11 = int_to_ptr.vmem [resolvable:$true] %s201_s11 }
  0x13   : > { %s214_s14 = sshll.u32 %s2840_s13, 4  ;;  %s2711_s17 = scalar_lea.hbm %s4199_s3, 8192  ;;  %s2943_s14 = int_to_ptr.vmem [resolvable:$true] %s214_s14 }
  0x14   : > { %p2939_p12 = pnand %p4203_p9, %p2592_p11  ;;  %p2712_p13 = scmp.ne.s32.totalorder %s4199_s3, %s2711_s17 }
  0x15   : > { %p2718_p3 = scmp.lt.u32.totalorder %s2711_s17, %s4199_s3 }
  0x16   : > { %p2713_p0 = pneg %p2939_p12 }
  0x18   : > { %p2714_p1 = pnand %p2713_p0, %p2712_p13 }
  0x1a   : > { %p2715_p2 = pneg %p2714_p1 }
  0x1c   : > { %p2720_p4 = pnand %p2718_p3, %p2715_p2 }
  0x1e   : > { %2723 = shalt.err (!%p2720_p4)
}
  0x1f   : > { %s2724_s28 = scalar_lea.vmem %s202_s11, 8192  ;;  %p2732_p9 = scmp.lt.s32.totalorder %s202_s11, %s202_s11 }
  0x20   : > { %p2725_p7 = scmp.ne.s32.totalorder %s202_s11, %s2724_s28  ;;  %p2733_p6 = scmp.lt.s32.totalorder %s2724_s28, %s2724_s28 }
  0x22   : > { %p2727_p8 = pnand %p2725_p7, %p2713_p0  ;;  %p2734_p5 = por %p2733_p6, %p2732_p9 }
  0x24   : > { %p2728_p11 = pneg %p2727_p8 }
  0x26   : > { %p2735_p10 = pnand %p2734_p5, %p2728_p11 }
  0x28   : > { %2738 = shalt.err (!%p2735_p10)
}
  0x29   : > { %s2841_s29 = smov 256   ;;  %s2842_s10 = smov 16  }
  0x2a   : > { %2595 = dma.hbm_to_vmem [thread:$0]  (!%p2939_p12), %s4199_s3, 8192, %s202_s11, [#allocation3], %s2841_s29, %s2841_s29, %s2842_s10  }
  0x2b   : > { %s2739_s18 = scalar_lea.hbm %s4200_s4, 4096 }
  0x2c   : > { %p2740_p13 = scmp.ne.s32.totalorder %s4200_s4, %s2739_s18  ;;  %p2746_p9 = scmp.lt.u32.totalorder %s2739_s18, %s4200_s4 }
  0x2e   : > { %p2742_p5 = pnand %p2740_p13, %p2713_p0 }
  0x30   : > { %p2743_p6 = pneg %p2742_p5 }
  0x32   : > { %p2748_p10 = pnand %p2746_p9, %p2743_p6 }
  0x34   : > { %2751 = shalt.err (!%p2748_p10)
}
  0x35   : > { %s2752_s11 = scalar_lea.vmem %s2943_s14, 4096  ;;  %p2760_p4 = scmp.lt.s32.totalorder %s2943_s14, %s2943_s14 }
  0x36   : > { %p2753_p1 = scmp.ne.s32.totalorder %s2943_s14, %s2752_s11  ;;  %p2761_p7 = scmp.lt.s32.totalorder %s2752_s11, %s2752_s11 }
  0x38   : > { %p2755_p2 = pnand %p2753_p1, %p2713_p0  ;;  %p2762_p8 = por %p2761_p7, %p2760_p4 }
  0x3a   : > { %p2756_p3 = pneg %p2755_p2 }
  0x3c   : > { %p2763_p11 = pnand %p2762_p8, %p2756_p3 }
  0x3e   : > { %2766 = shalt.err (!%p2763_p11)
}
  0x3f   : > { %2598 = dma.hbm_to_vmem [thread:$0]  (!%p2939_p12), %s4200_s4, 4096, %s2943_s14, [#allocation6], %s2841_s29, %s2841_s29, %s2842_s10  }
  0x40   : > { %p4259_p13 = scmp.ne.s32.totalorder %s4257_s9, 0 }
  0x42   : > { %242 = sbr.rel (%p4259_p13) target bundleno = 2002 (0x7d2), region = 44 }
  0x49   : > { %p4260_p5 = scmp.eq.s32.totalorder %s2903_s25, 0 }
  0x4b   : > { %2812 = dma.done.wait (%p4260_p5), [#allocation3], 8192   ;;  %p4261_p0 = pmov %p4260_p5 }
  0x4d   : > { %2814 = vsyncadd (%p4261_p0), [#allocation3], 4294959104  ;;  %p4262_p6 = pmov %p4261_p0 }
  0x4e   : > { %p4263_p9 = pmov %p4261_p0 }
  0x4f   : > { %2816 = dma.done.wait (%p4262_p6), [#allocation6], 4096  }
  0x50   : > { %2818 = vsyncadd (%p4263_p9), [#allocation6], 4294963200  ;;  %s3003_s12 = sshll.u32 %s2903_s25, 5  ;;  %v4208_v0 = vmov 0.0   ;;  %v379_v1 = vld [vmem:[%s4198_s2 + $0x8] sm:$0xff]  ;;  %v381_v2 = vld [vmem:[%s4198_s2 + $0x18] sm:$0xff] }
  0x51   : > { %552 = vmatprep.mubr.f32.mxu0 %v4208_v0  ;;  %p277_p12 = scmp.lt.s32.totalorder %s3003_s12, 63  ;;  %648 = vmatprep.mubr.f32.mxu1 %v4208_v0  ;;  %v378_v3 = vld [vmem:[%s4198_s2] sm:$0xff]  ;;  %v2286_v4 = vpack.c.bf16 %v381_v2, %v379_v1  ;;  %v380_v5 = vld [vmem:[%s4198_s2 + $0x10] sm:$0xff]  ;;  %v383_v7 = vld [vmem:[%s4198_s2 + $0x28] sm:$0x1]  ;;  %vm481_vm0 = vcmask 1040384   ;;  %s4154_s28 = scalar_lea.hbm %s4202_s6, %s3003_s12 }
  0x52   : > { %v2288_v6 = vpack.c.bf16 %v380_v5, %v378_v3  ;;  %v382_v8 = vld [vmem:[%s4198_s2 + $0x20] sm:$0x1]  ;;  %vm384_vm1 = vcmask 138240   ;;  %v810_v14 = vld [vmem:[#allocation2 + $0x8] sm:$0xff]  ;;  %v812_v15 = vld [vmem:[#allocation2 + $0x18] sm:$0xff]  ;;  %s273_s17 = sand.u32 1, %s2829_s22  }
  0x53   : > { %s278_s9 = scalar_select %p277_p12, %s3003_s12, 63  ;;  %2287 = vmatprep.subr.bf16.mxu0 %v2286_v4  ;;  %2578 = vmatprep.subr.bf16.mxu1 %v2286_v4  ;;  %v809_v16 = vld [vmem:[#allocation2] sm:$0xff]  ;;  %v811_v17 = vld [vmem:[#allocation2 + $0x10] sm:$0xff]  ;;  %v2290_v19 = vpack.c.bf16 %v812_v15, %v810_v14  ;;  %v814_v20 = vld [vmem:[#allocation2 + $0x28] sm:$0xff] }
  0x54   : > { %2289 = vmatpush1.bf16.msra.mxu0 %v2288_v6  ;;  %2580 = vmatpush1.bf16.msra.mxu1 %v2288_v6  ;;  %v816_v21 = vld [vmem:[#allocation2 + $0x38] sm:$0xff]  ;;  %v2292_v22 = vpack.c.bf16 %v811_v17, %v809_v16  ;;  %v813_v24 = vld [vmem:[#allocation2 + $0x20] sm:$0xff]  ;;  %v815_v25 = vld [vmem:[#allocation2 + $0x30] sm:$0xff]  ;;  %s2209_s25 = sshll.u32 %s273_s17, 1  ;;  %s2106_s11 = scalar_lea.sflag [#allocation4], %s273_s17 }
  0x55   : > { %s2211_s18 = sshll.u32 %s278_s9, 3  ;;  %2212 = vmatprep.subr.msk.mxu0 %vm481_vm0, %v383_v7  ;;  %2579 = vmatprep.subr.msk.mxu1 %vm481_vm0, %v383_v7  ;;  %v2294_v23 = vpack.c.bf16 %v816_v21, %v814_v20  ;;  %v818_v26 = vld [vmem:[#allocation2 + $0x48] sm:$0xff]  ;;  %v820_v27 = vld [vmem:[#allocation2 + $0x58] sm:$0xff]  ;;  %v2296_v30 = vpack.c.bf16 %v815_v25, %v813_v24  ;;  %v817_v32 = vld [vmem:[#allocation2 + $0x40] sm:$0xff]  ;;  %p4356_p1 = scmp.ne.s32.totalorder %s4255_s7, 0 }
  0x56   : > { %s3027_s15 = scalar_lea.vmem %s4196_s0, %s2211_s18  ;;  %v2298_v31 = vpack.c.bf16 %v820_v27, %v818_v26  ;;  %v819_v33 = vld [vmem:[#allocation2 + $0x50] sm:$0xff]  ;;  %v822_v34 = vld [vmem:[#allocation2 + $0x68] sm:$0xff]  ;;  %v824_v35 = vld [vmem:[#allocation2 + $0x78] sm:$0xff]  ;;  %s275_s18 = scalar_lea.vmem [#allocation7], %s2209_s25 }
  0x57   : > { %v282_v9 = vld [vmem:[%s3027_s15] sm:$0xff]  ;;  %v283_v11 = vld [vmem:[%s3027_s15 + $0x8] sm:$0xff]  ;;  %v284_v13 = vld [vmem:[%s3027_s15 + $0x10] sm:$0xff]  ;;  %v2300_v38 = vpack.c.bf16 %v819_v33, %v817_v32  ;;  %v2302_v39 = vpack.c.bf16 %v824_v35, %v822_v34  ;;  %s2120_s19 = sshll.u32 %s275_s18, 4  ;;  %s4156_s19 = int_to_ptr.vmem [resolvable:$true] %s2120_s19 }
  0x58   : > { %v298_v10 = vld [vmem:[%s3027_s15 + $0x80] sm:$0xff]  ;;  %2213 = vmatpush1.msk.msra.mxu0 %vm481_vm0, %v382_v8  ;;  %2581 = vmatpush1.msk.msra.mxu1 %vm481_vm0, %v382_v8  ;;  %v299_v12 = vld [vmem:[%s3027_s15 + $0x88] sm:$0xff]  ;;  %v300_v18 = vld [vmem:[%s3027_s15 + $0x90] sm:$0xff]  ;;  %s2767_s13 = scalar_lea.vmem %s4156_s19, 32 }
  0x59   : > { %2214 = vmatmul.mubr.msk.f32.vlgmr.msra.gmra.mrb[0].mxu0 %vm384_vm1, %v282_v9  ;;  %2230 = vmatmul.mubr.msk.f32.vlgmr.msra.gmra.mrb[0].mxu1 %vm384_vm1, %v298_v10  ;;  %v285_v28 = vld [vmem:[%s3027_s15 + $0x18] sm:$0xff]  ;;  %v286_v36 = vld [vmem:[%s3027_s15 + $0x20] sm:$0xff]  ;;  %v823_v41 = vld [vmem:[#allocation2 + $0x70] sm:$0xff]  ;;  %p2768_p10 = scmp.ne.s32.totalorder %s4156_s19, %s2767_s13 }
  0x5a   : > { %558 = vmatprep.mubr.f32.mxu0 %v4208_v0  ;;  %654 = vmatprep.mubr.f32.mxu1 %v4208_v0  ;;  %v301_v29 = vld [vmem:[%s3027_s15 + $0x98] sm:$0xff]  ;;  %v302_v37 = vld [vmem:[%s3027_s15 + $0xa0] sm:$0xff]  ;;  %v826_v42 = vld [vmem:[#allocation2 + $0x88] sm:$0xff] }
  0x5b   : > { %2291 = vmatprep.subr.bf16.mxu1 %v2290_v19  ;;  %v821_v40 = vld [vmem:[#allocation2 + $0x60] sm:$0xff]  ;;  %v828_v43 = vld [vmem:[#allocation2 + $0x98] sm:$0xff]  ;;  %v287_v44 = vld [vmem:[%s3027_s15 + $0x28] sm:$0xff]  ;;  %p2769_p2 = pnand %p2768_p10, %p4356_p1 }
  0x5c   : > { %2293 = vmatpush1.bf16.msra.mxu1 %v2292_v22  ;;  %v303_v45 = vld [vmem:[%s3027_s15 + $0xa8] sm:$0xff]  ;;  %v2304_v46 = vpack.c.bf16 %v823_v41, %v821_v40  ;;  %v2306_v47 = vpack.c.bf16 %v828_v43, %v826_v42  ;;  %v825_v48 = vld [vmem:[#allocation2 + $0x80] sm:$0xff]  ;;  %v827_v49 = vld [vmem:[#allocation2 + $0x90] sm:$0xff] }
  0x5d   : > { %2215 = vmatmul.mubr.msk.f32.gmra.mrb[2].mxu0 %vm384_vm1, %v283_v11  ;;  %2231 = vmatmul.mubr.msk.f32.gmra.mrb[2].mxu1 %vm384_vm1, %v299_v12  ;;  %v830_v50 = vld [vmem:[#allocation2 + $0xa8] sm:$0xff]  ;;  %v832_v51 = vld [vmem:[#allocation2 + $0xb8] sm:$0xff]  ;;  %v288_v52 = vld [vmem:[%s3027_s15 + $0x30] sm:$0xff]  ;;  %v2308_v54 = vpack.c.bf16 %v827_v49, %v825_v48  ;;  %p2770_p3 = pneg %p2769_p2 }
  0x5e   : > { %564 = vmatprep.mubr.f32.mxu0 %v4208_v0  ;;  %660 = vmatprep.mubr.f32.mxu1 %v4208_v0  ;;  %v304_v53 = vld [vmem:[%s3027_s15 + $0xb0] sm:$0xff]  ;;  %v2310_v55 = vpack.c.bf16 %v832_v51, %v830_v50  ;;  %v829_v56 = vld [vmem:[#allocation2 + $0xa0] sm:$0xff]  ;;  %v834_v58 = vld [vmem:[#allocation2 + $0xc8] sm:$0xff] }
  0x5f   : > { %2295 = vmatprep.subr.bf16.mxu1 %v2294_v23  ;;  %v831_v57 = vld [vmem:[#allocation2 + $0xb0] sm:$0xff]  ;;  %v836_v59 = vld [vmem:[#allocation2 + $0xd8] sm:$0xff]  ;;  %v833_v1 = vld [vmem:[#allocation2 + $0xc0] sm:$0xff] }
  0x60   : > { %2297 = vmatpush1.bf16.msra.mxu1 %v2296_v30  ;;  %v289_v60 = vld [vmem:[%s3027_s15 + $0x38] sm:$0xff]  ;;  %v2312_v62 = vpack.c.bf16 %v831_v57, %v829_v56  ;;  %v2314_v63 = vpack.c.bf16 %v836_v59, %v834_v58  ;;  %v835_v2 = vld [vmem:[#allocation2 + $0xd0] sm:$0xff]  ;;  %v838_v3 = vld [vmem:[#allocation2 + $0xe8] sm:$0xff] }
  0x61   : > { %2216 = vmatmul.mubr.msk.f32.gmra.mrb[4].mxu0 %vm384_vm1, %v284_v13  ;;  %2232 = vmatmul.mubr.msk.f32.gmra.mrb[4].mxu1 %vm384_vm1, %v300_v18  ;;  %v305_v61 = vld [vmem:[%s3027_s15 + $0xb8] sm:$0xff]  ;;  %v290_v5 = vld [vmem:[%s3027_s15 + $0x40] sm:$0xff]  ;;  %v2316_v7 = vpack.c.bf16 %v835_v2, %v833_v1  ;;  %v839_v10 = vld [vmem:[#allocation2 + $0xf0] sm:$0xff] }
  0x62   : > { %570 = vmatprep.mubr.f32.mxu0 %v4208_v0  ;;  %666 = vmatprep.mubr.f32.mxu1 %v4208_v0  ;;  %v840_v4 = vld [vmem:[#allocation2 + $0xf8] sm:$0xff]  ;;  %v306_v6 = vld [vmem:[%s3027_s15 + $0xc0] sm:$0xff]  ;;  %v842_v11 = vld [vmem:[#allocation2 + $0x108] sm:$0xff] }
  0x63   : > { %2299 = vmatprep.subr.bf16.mxu1 %v2298_v31  ;;  %v2318_v8 = vpack.c.bf16 %v840_v4, %v838_v3  ;;  %v837_v9 = vld [vmem:[#allocation2 + $0xe0] sm:$0xff]  ;;  %v844_v12 = vld [vmem:[#allocation2 + $0x118] sm:$0xff]  ;;  %v291_v13 = vld [vmem:[%s3027_s15 + $0x48] sm:$0xff] }
  0x64   : > { %2301 = vmatpush1.bf16.msra.mxu1 %v2300_v38  ;;  %v307_v14 = vld [vmem:[%s3027_s15 + $0xc8] sm:$0xff]  ;;  %v2320_v15 = vpack.c.bf16 %v839_v10, %v837_v9  ;;  %v2322_v16 = vpack.c.bf16 %v844_v12, %v842_v11  ;;  %v841_v17 = vld [vmem:[#allocation2 + $0x100] sm:$0xff]  ;;  %v843_v18 = vld [vmem:[#allocation2 + $0x110] sm:$0xff] }
  0x65   : > { %2217 = vmatmul.mubr.msk.f32.gmra.mrb[6].mxu0 %vm384_vm1, %v285_v28  ;;  %2233 = vmatmul.mubr.msk.f32.gmra.mrb[6].mxu1 %vm384_vm1, %v301_v29  ;;  %v846_v19 = vld [vmem:[#allocation2 + $0x128] sm:$0xff]  ;;  %v848_v20 = vld [vmem:[#allocation2 + $0x138] sm:$0xff]  ;;  %v292_v21 = vld [vmem:[%s3027_s15 + $0x50] sm:$0xff]  ;;  %v2324_v23 = vpack.c.bf16 %v843_v18, %v841_v17 }
  0x66   : > { %576 = vmatprep.mubr.f32.mxu0 %v4208_v0  ;;  %672 = vmatprep.mubr.f32.mxu1 %v4208_v0  ;;  %v308_v22 = vld [vmem:[%s3027_s15 + $0xd0] sm:$0xff]  ;;  %v2326_v24 = vpack.c.bf16 %v848_v20, %v846_v19  ;;  %v845_v25 = vld [vmem:[#allocation2 + $0x120] sm:$0xff]  ;;  %v850_v27 = vld [vmem:[#allocation2 + $0x148] sm:$0xff] }
  0x67   : > { %2303 = vmatprep.subr.bf16.mxu1 %v2302_v39  ;;  %v847_v26 = vld [vmem:[#allocation2 + $0x130] sm:$0xff]  ;;  %v852_v28 = vld [vmem:[#allocation2 + $0x158] sm:$0xff]  ;;  %v849_v33 = vld [vmem:[#allocation2 + $0x140] sm:$0xff] }
  0x68   : > { %2305 = vmatpush1.bf16.msra.mxu1 %v2304_v46  ;;  %v293_v29 = vld [vmem:[%s3027_s15 + $0x58] sm:$0xff]  ;;  %v2328_v31 = vpack.c.bf16 %v847_v26, %v845_v25  ;;  %v2330_v32 = vpack.c.bf16 %v852_v28, %v850_v27  ;;  %v851_v34 = vld [vmem:[#allocation2 + $0x150] sm:$0xff]  ;;  %v854_v35 = vld [vmem:[#allocation2 + $0x168] sm:$0xff] }
  0x69   : > { %2218 = vmatmul.mubr.msk.f32.gmra.mrb[8].mxu0 %vm384_vm1, %v286_v36  ;;  %2234 = vmatmul.mubr.msk.f32.gmra.mrb[8].mxu1 %vm384_vm1, %v302_v37  ;;  %v309_v30 = vld [vmem:[%s3027_s15 + $0xd8] sm:$0xff]  ;;  %v294_v37 = vld [vmem:[%s3027_s15 + $0x60] sm:$0xff]  ;;  %v2332_v39 = vpack.c.bf16 %v851_v34, %v849_v33  ;;  %v855_v42 = vld [vmem:[#allocation2 + $0x170] sm:$0xff] }
  0x6a   : > { %582 = vmatprep.mubr.f32.mxu0 %v4208_v0  ;;  %678 = vmatprep.mubr.f32.mxu1 %v4208_v0  ;;  %v856_v36 = vld [vmem:[#allocation2 + $0x178] sm:$0xff]  ;;  %v310_v38 = vld [vmem:[%s3027_s15 + $0xe0] sm:$0xff]  ;;  %v858_v43 = vld [vmem:[#allocation2 + $0x188] sm:$0xff] }
  0x6b   : > { %2307 = vmatprep.subr.bf16.mxu1 %v2306_v47  ;;  %v2334_v40 = vpack.c.bf16 %v856_v36, %v854_v35  ;;  %v853_v41 = vld [vmem:[#allocation2 + $0x160] sm:$0xff]  ;;  %v311_v46 = vld [vmem:[%s3027_s15 + $0xe8] sm:$0xff]  ;;  %v859_v50 = vld [vmem:[#allocation2 + $0x190] sm:$0xff] }
  0x6c   : > { %2309 = vmatpush1.bf16.msra.mxu1 %v2308_v54  ;;  %v2336_v47 = vpack.c.bf16 %v855_v42, %v853_v41  ;;  %v857_v49 = vld [vmem:[#allocation2 + $0x180] sm:$0xff]  ;;  %v862_v51 = vld [vmem:[#allocation2 + $0x1a8] sm:$0xff]  ;;  %v312_v54 = vld [vmem:[%s3027_s15 + $0xf0] sm:$0xff] }
  0x6d   : > { %2219 = vmatmul.mubr.msk.f32.gmra.mrb[10].mxu0 %vm384_vm1, %v287_v44  ;;  %2235 = vmatmul.mubr.msk.f32.gmra.mrb[10].mxu1 %vm384_vm1, %v303_v45  ;;  %v860_v44 = vld [vmem:[#allocation2 + $0x198] sm:$0xff]  ;;  %v295_v45 = vld [vmem:[%s3027_s15 + $0x68] sm:$0xff]  ;;  %v861_v57 = vld [vmem:[#allocation2 + $0x1a0] sm:$0xff] }
  0x6e   : > { %588 = vmatprep.mubr.f32.mxu0 %v4208_v0  ;;  %684 = vmatprep.mubr.f32.mxu1 %v4208_v0  ;;  %v2338_v48 = vpack.c.bf16 %v860_v44, %v858_v43  ;;  %v863_v58 = vld [vmem:[#allocation2 + $0x1b0] sm:$0xff]  ;;  %v866_v59 = vld [vmem:[#allocation2 + $0x1c8] sm:$0xff]  ;;  %v865_v2 = vld [vmem:[#allocation2 + $0x1c0] sm:$0xff] }
  0x6f   : > { %2311 = vmatprep.subr.bf16.mxu1 %v2310_v55  ;;  %v2340_v55 = vpack.c.bf16 %v859_v50, %v857_v49  ;;  %v867_v3 = vld [vmem:[#allocation2 + $0x1d0] sm:$0xff] }
  0x70   : > { %2313 = vmatpush1.bf16.msra.mxu1 %v2312_v62  ;;  %v313_v62 = vld [vmem:[%s3027_s15 + $0xf8] sm:$0xff]  ;;  %v2348_v4 = vpack.c.bf16 %v867_v3, %v865_v2  ;;  %v871_v9 = vld [vmem:[#allocation2 + $0x1f0] sm:$0xff] }
  0x71   : > { %2220 = vmatmul.mubr.msk.f32.gmra.mrb[12].mxu0 %vm384_vm1, %v288_v52  ;;  %2236 = vmatmul.mubr.msk.f32.gmra.mrb[12].mxu1 %vm384_vm1, %v304_v53  ;;  %v864_v52 = vld [vmem:[#allocation2 + $0x1b8] sm:$0xff]  ;;  %v296_v53 = vld [vmem:[%s3027_s15 + $0x70] sm:$0xff] }
  0x72   : > { %594 = vmatprep.mubr.f32.mxu0 %v4208_v0  ;;  %690 = vmatprep.mubr.f32.mxu1 %v4208_v0  ;;  %v2342_v56 = vpack.c.bf16 %v864_v52, %v862_v51 }
  0x73   : > { %2315 = vmatprep.subr.bf16.mxu1 %v2314_v63  ;;  %v2344_v63 = vpack.c.bf16 %v863_v58, %v861_v57 }
  0x74   : > { %2317 = vmatpush1.bf16.msra.mxu1 %v2316_v7 }
  0x75   : > { %2221 = vmatmul.mubr.msk.f32.gmra.mrb[14].mxu0 %vm384_vm1, %v289_v60  ;;  %2237 = vmatmul.mubr.msk.f32.gmra.mrb[14].mxu1 %vm384_vm1, %v305_v61  ;;  %v868_v60 = vld [vmem:[#allocation2 + $0x1d8] sm:$0xff] }
  0x76   : > { %600 = vmatprep.mubr.f32.mxu0 %v4208_v0  ;;  %696 = vmatprep.mubr.f32.mxu1 %v4208_v0  ;;  %v297_v61 = vld [vmem:[%s3027_s15 + $0x78] sm:$0xff]  ;;  %v2346_v1 = vpack.c.bf16 %v868_v60, %v866_v59  ;;  %s2846_s15 = smov [#allocation7]  }
  0x77   : > { %2319 = vmatprep.subr.bf16.mxu1 %v2318_v8  ;;  %v869_v8 = vld [vmem:[#allocation2 + $0x1e0] sm:$0xff]  ;;  %s2771_s9 = sshll.u32 %s2846_s15, 4  ;;  %s2772_s9 = int_to_ptr.vmem [resolvable:$false] %s2771_s9 }
  0x78   : > { %2321 = vmatpush1.bf16.msra.mxu1 %v2320_v15  ;;  %v2352_v10 = vpack.c.bf16 %v871_v9, %v869_v8  ;;  %s2773_s14 = scalar_lea.vmem %s2772_s9, 64  ;;  %p2774_p4 = scmp.lt.s32.totalorder %s4156_s19, %s2772_s9 }
  0x79   : > { %2222 = vmatmul.mubr.msk.f32.gmra.mrb[16].mxu0 %vm384_vm1, %v290_v5  ;;  %2238 = vmatmul.mubr.msk.f32.gmra.mrb[16].mxu1 %vm384_vm1, %v306_v6  ;;  %v870_v5 = vld [vmem:[#allocation2 + $0x1e8] sm:$0xff]  ;;  %v872_v6 = vld [vmem:[#allocation2 + $0x1f8] sm:$0xff]  ;;  %p2775_p7 = scmp.lt.s32.totalorder %s2773_s14, %s2767_s13 }
  0x7a   : > { %606 = vmatprep.mubr.f32.mxu0 %v4208_v0  ;;  %702 = vmatprep.mubr.f32.mxu1 %v4208_v0  ;;  %v2350_v7 = vpack.c.bf16 %v872_v6, %v870_v5 }
  0x7b   : > { %2323 = vmatprep.subr.bf16.mxu1 %v2322_v16  ;;  %p2776_p8 = por %p2775_p7, %p2774_p4 }
  0x7c   : > { %2325 = vmatpush1.bf16.msra.mxu1 %v2324_v23 }
  0x7d   : > { %2223 = vmatmul.mubr.msk.f32.gmra.mrb[18].mxu0 %vm384_vm1, %v291_v13  ;;  %2239 = vmatmul.mubr.msk.f32.gmra.mrb[18].mxu1 %vm384_vm1, %v307_v14  ;;  %p2777_p11 = pnand %p2776_p8, %p2770_p3 }
  0x7e   : > { %612 = vmatprep.mubr.f32.mxu0 %v4208_v0  ;;  %708 = vmatprep.mubr.f32.mxu1 %v4208_v0 }
  0x7f   : > { %2327 = vmatprep.subr.bf16.mxu1 %v2326_v24 }
  0x80   : > { %2329 = vmatpush1.bf16.msra.mxu1 %v2328_v31 }
  0x81   : > { %2224 = vmatmul.mubr.msk.f32.gmra.mrb[20].mxu0 %vm384_vm1, %v292_v21  ;;  %2240 = vmatmul.mubr.msk.f32.gmra.mrb[20].mxu1 %vm384_vm1, %v308_v22 }
  0x82   : > { %618 = vmatprep.mubr.f32.mxu0 %v4208_v0  ;;  %714 = vmatprep.mubr.f32.mxu1 %v4208_v0 }
  0x83   : > { %2331 = vmatprep.subr.bf16.mxu1 %v2330_v32 }
  0x84   : > { %2333 = vmatpush1.bf16.msra.mxu1 %v2332_v39 }
  0x85   : > { %2225 = vmatmul.mubr.msk.f32.gmra.mrb[22].mxu0 %vm384_vm1, %v293_v29  ;;  %2241 = vmatmul.mubr.msk.f32.gmra.mrb[22].mxu1 %vm384_vm1, %v309_v30 }
  0x86   : > { %624 = vmatprep.mubr.f32.mxu0 %v4208_v0  ;;  %720 = vmatprep.mubr.f32.mxu1 %v4208_v0 }
  0x87   : > { %2335 = vmatprep.subr.bf16.mxu1 %v2334_v40 }
  0x88   : > { %2337 = vmatpush1.bf16.msra.mxu1 %v2336_v47 }
  0x89   : > { %2226 = vmatmul.mubr.msk.f32.gmra.mrb[24].mxu0 %vm384_vm1, %v294_v37  ;;  %2242 = vmatmul.mubr.msk.f32.gmra.mrb[24].mxu1 %vm384_vm1, %v310_v38 }
  0x8a   : > { %630 = vmatprep.mubr.f32.mxu0 %v4208_v0  ;;  %726 = vmatprep.mubr.f32.mxu1 %v4208_v0 }
  0x8b   : > { %2339 = vmatprep.subr.bf16.mxu1 %v2338_v48 }
  0x8c   : > { %2341 = vmatpush1.bf16.msra.mxu1 %v2340_v55 }
  0x8d   : > { %2227 = vmatmul.mubr.msk.f32.gmra.mrb[26].mxu0 %vm384_vm1, %v295_v45  ;;  %2243 = vmatmul.mubr.msk.f32.gmra.mrb[26].mxu1 %vm384_vm1, %v311_v46 }
  0x8e   : > { %636 = vmatprep.mubr.f32.mxu0 %v4208_v0  ;;  %732 = vmatprep.mubr.f32.mxu1 %v4208_v0 }
  0x8f   : > { %2343 = vmatprep.subr.bf16.mxu1 %v2342_v56 }
  0x90   : > { %2345 = vmatpush1.bf16.msra.mxu1 %v2344_v63 }
  0x91   : > { %2228 = vmatmul.mubr.msk.f32.gmra.mrb[28].mxu0 %vm384_vm1, %v296_v53  ;;  %2244 = vmatmul.mubr.msk.f32.gmra.mrb[28].mxu1 %vm384_vm1, %v312_v54 }
  0x92   : > { %642 = vmatprep.mubr.f32.mxu0 %v4208_v0  ;;  %738 = vmatprep.mubr.f32.mxu1 %v4208_v0 }
  0x93   : > { %2347 = vmatprep.subr.bf16.mxu1 %v2346_v1 }
  0x94   : > { %2349 = vmatpush1.bf16.msra.mxu1 %v2348_v4 }
  0x95   : > { %2229 = vmatmul.mubr.msk.f32.gmra.mrb[30].mxu0 %vm384_vm1, %v297_v61  ;;  %2245 = vmatmul.mubr.msk.f32.gmra.mrb[30].mxu1 %vm384_vm1, %v313_v62 }
  0x96   : > { %2351 = vmatprep.subr.bf16.mxu1 %v2350_v7 }
  0x98   : > { %2353 = vmatpush1.bf16.msra.mxu1 %v2352_v10 }
 0x12c   : > { %v554_v11 = vpop.f32.mrb[0].mxu0  ;;  %v3126_v12 = vpop.f32.mrb[0].mxu1 }
 0x12d   : > { %v556_v13 = vpop.f32.mrb[1].mxu0  ;;  %v3128_v14 = vpop.f32.mrb[1].mxu1  ;;  %v745_v16 = vmax.f32 %v554_v11, 0.0 }
 0x12e   : > { %v746_v15 = vmax.f32 %v556_v13, 0.0 }
 0x130   : > { %v560_v17 = vpop.f32.mrb[2].mxu0  ;;  %937 = vmatprep.mubr.f32.mxu1 %v746_v15  ;;  %v3130_v18 = vpop.f32.mrb[2].mxu1 }
 0x131   : > { %v562_v19 = vpop.f32.mrb[3].mxu0  ;;  %938 = vmatmul.mubr.f32.vlgmr.msra.gmra.mrb[32].mxu1 %v745_v16  ;;  %v3132_v20 = vpop.f32.mrb[3].mxu1  ;;  %v747_v22 = vmax.f32 %v560_v17, 0.0 }
 0x132   : > { %v748_v21 = vmax.f32 %v562_v19, 0.0 }
 0x134   : > { %v566_v23 = vpop.f32.mrb[4].mxu0  ;;  %943 = vmatprep.mubr.f32.mxu1 %v748_v21  ;;  %v3134_v24 = vpop.f32.mrb[4].mxu1 }
 0x135   : > { %v568_v25 = vpop.f32.mrb[5].mxu0  ;;  %944 = vmatmul.mubr.f32.gmra.mrb[34].mxu1 %v747_v22  ;;  %v3136_v26 = vpop.f32.mrb[5].mxu1  ;;  %v749_v28 = vmax.f32 %v566_v23, 0.0 }
 0x136   : > { %v750_v27 = vmax.f32 %v568_v25, 0.0 }
 0x138   : > { %v572_v29 = vpop.f32.mrb[6].mxu0  ;;  %949 = vmatprep.mubr.f32.mxu1 %v750_v27  ;;  %v3138_v30 = vpop.f32.mrb[6].mxu1 }
 0x139   : > { %v574_v31 = vpop.f32.mrb[7].mxu0  ;;  %950 = vmatmul.mubr.f32.gmra.mrb[36].mxu1 %v749_v28  ;;  %v3140_v32 = vpop.f32.mrb[7].mxu1  ;;  %v751_v34 = vmax.f32 %v572_v29, 0.0 }
 0x13a   : > { %v752_v33 = vmax.f32 %v574_v31, 0.0 }
 0x13c   : > { %v578_v35 = vpop.f32.mrb[8].mxu0  ;;  %955 = vmatprep.mubr.f32.mxu1 %v752_v33  ;;  %v3142_v36 = vpop.f32.mrb[8].mxu1 }
 0x13d   : > { %v580_v37 = vpop.f32.mrb[9].mxu0  ;;  %956 = vmatmul.mubr.f32.gmra.mrb[38].mxu1 %v751_v34  ;;  %v3144_v38 = vpop.f32.mrb[9].mxu1  ;;  %v753_v40 = vmax.f32 %v578_v35, 0.0 }
 0x13e   : > { %v754_v39 = vmax.f32 %v580_v37, 0.0 }
 0x140   : > { %v584_v41 = vpop.f32.mrb[10].mxu0  ;;  %961 = vmatprep.mubr.f32.mxu1 %v754_v39  ;;  %v3146_v42 = vpop.f32.mrb[10].mxu1 }
 0x141   : > { %v586_v43 = vpop.f32.mrb[11].mxu0  ;;  %962 = vmatmul.mubr.f32.gmra.mrb[40].mxu1 %v753_v40  ;;  %v3148_v44 = vpop.f32.mrb[11].mxu1  ;;  %v755_v46 = vmax.f32 %v584_v41, 0.0 }
 0x142   : > { %v756_v45 = vmax.f32 %v586_v43, 0.0 }
 0x144   : > { %v590_v47 = vpop.f32.mrb[12].mxu0  ;;  %967 = vmatprep.mubr.f32.mxu1 %v756_v45  ;;  %v3150_v48 = vpop.f32.mrb[12].mxu1 }
 0x145   : > { %v592_v49 = vpop.f32.mrb[13].mxu0  ;;  %968 = vmatmul.mubr.f32.gmra.mrb[42].mxu1 %v755_v46  ;;  %v3152_v50 = vpop.f32.mrb[13].mxu1  ;;  %v757_v52 = vmax.f32 %v590_v47, 0.0 }
 0x146   : > { %v758_v51 = vmax.f32 %v592_v49, 0.0 }
 0x148   : > { %v596_v53 = vpop.f32.mrb[14].mxu0  ;;  %973 = vmatprep.mubr.f32.mxu1 %v758_v51  ;;  %v3154_v54 = vpop.f32.mrb[14].mxu1 }
 0x149   : > { %v598_v55 = vpop.f32.mrb[15].mxu0  ;;  %974 = vmatmul.mubr.f32.gmra.mrb[44].mxu1 %v757_v52  ;;  %v3156_v56 = vpop.f32.mrb[15].mxu1  ;;  %v759_v58 = vmax.f32 %v596_v53, 0.0 }
 0x14a   : > { %v760_v57 = vmax.f32 %v598_v55, 0.0 }
 0x14c   : > { %v602_v59 = vpop.f32.mrb[16].mxu0  ;;  %979 = vmatprep.mubr.f32.mxu1 %v760_v57  ;;  %v3158_v60 = vpop.f32.mrb[16].mxu1 }
 0x14d   : > { %v604_v61 = vpop.f32.mrb[17].mxu0  ;;  %980 = vmatmul.mubr.f32.gmra.mrb[46].mxu1 %v759_v58  ;;  %v3160_v62 = vpop.f32.mrb[17].mxu1  ;;  %v761_v1 = vmax.f32 %v602_v59, 0.0  ;;  %v778_v59 = vmax.f32 %v3128_v14, 0.0  ;;  %v781_v14 = vmax.f32 %v3134_v24, 0.0  ;;  %v792_v24 = vmax.f32 %v3156_v56, 0.0 }
 0x14e   : > { %v762_v63 = vmax.f32 %v604_v61, 0.0 }
 0x150   : > { %v608_v2 = vpop.f32.mrb[18].mxu0  ;;  %985 = vmatprep.mubr.f32.mxu1 %v762_v63  ;;  %v3162_v3 = vpop.f32.mrb[18].mxu1  ;;  %v780_v63 = vmax.f32 %v3132_v20, 0.0  ;;  %v783_v20 = vmax.f32 %v3138_v30, 0.0  ;;  %v794_v30 = vmax.f32 %v3160_v62, 0.0 }
 0x151   : > { %v610_v4 = vpop.f32.mrb[19].mxu0  ;;  %986 = vmatmul.mubr.f32.gmra.mrb[48].mxu1 %v761_v1  ;;  %v3164_v5 = vpop.f32.mrb[19].mxu1  ;;  %v763_v7 = vmax.f32 %v608_v2, 0.0  ;;  %v777_v1 = vmax.f32 %v3126_v12, 0.0  ;;  %v782_v2 = vmax.f32 %v3136_v26, 0.0  ;;  %v788_v12 = vmax.f32 %v3148_v44, 0.0 }
 0x152   : > { %v764_v6 = vmax.f32 %v610_v4, 0.0  ;;  %v779_v4 = vmax.f32 %v3130_v18, 0.0  ;;  %v785_v26 = vmax.f32 %v3142_v36, 0.0  ;;  %v790_v18 = vmax.f32 %v3152_v50, 0.0 }
 0x153   : > { %v791_v36 = vmax.f32 %v3154_v54, 0.0  ;;  %v796_v44 = vmax.f32 %v3164_v5, 0.0 }
 0x154   : > { %v614_v8 = vpop.f32.mrb[20].mxu0  ;;  %991 = vmatprep.mubr.f32.mxu1 %v764_v6  ;;  %v3166_v9 = vpop.f32.mrb[20].mxu1  ;;  %v784_v6 = vmax.f32 %v3140_v32, 0.0  ;;  %v787_v32 = vmax.f32 %v3146_v42, 0.0  ;;  %v793_v42 = vmax.f32 %v3158_v60, 0.0 }
 0x155   : > { %v616_v10 = vpop.f32.mrb[21].mxu0  ;;  %992 = vmatmul.mubr.f32.gmra.mrb[50].mxu1 %v763_v7  ;;  %v3168_v11 = vpop.f32.mrb[21].mxu1  ;;  %v765_v15 = vmax.f32 %v614_v8, 0.0  ;;  %v786_v7 = vmax.f32 %v3144_v38, 0.0  ;;  %v789_v38 = vmax.f32 %v3150_v48, 0.0  ;;  %v4206_v8 = vmov 0.0|0.0  }
 0x156   : > { %v766_v13 = vmax.f32 %v616_v10, 0.0  ;;  %2354 = vmatprep.subr.bf16.mxu0 %v4206_v8  ;;  %v798_v50 = vmax.f32 %v3168_v11, 0.0  ;;  %v795_v48 = vmax.f32 %v3162_v3, 0.0  ;;  %v797_v62 = vmax.f32 %v3166_v9, 0.0 }
 0x158   : > { %v620_v16 = vpop.f32.mrb[22].mxu0  ;;  %997 = vmatprep.mubr.f32.mxu1 %v766_v13  ;;  %v3170_v17 = vpop.f32.mrb[22].mxu1 }
 0x159   : > { %v622_v19 = vpop.f32.mrb[23].mxu0  ;;  %998 = vmatmul.mubr.f32.gmra.mrb[52].mxu1 %v765_v15  ;;  %v3172_v21 = vpop.f32.mrb[23].mxu1  ;;  %v767_v23 = vmax.f32 %v620_v16, 0.0  ;;  %v799_v5 = vmax.f32 %v3170_v17, 0.0  ;;  %v3227_v16 = vld [vmem:[%s4197_s1 + $0x8] sm:$0xff] }
 0x15a   : > { %v768_v22 = vmax.f32 %v622_v19, 0.0  ;;  %v800_v56 = vmax.f32 %v3172_v21, 0.0  ;;  %1194 = vmatprep.mubr.f32.mxu0 %v3227_v16 }
 0x15c   : > { %v626_v25 = vpop.f32.mrb[24].mxu0  ;;  %1003 = vmatprep.mubr.f32.mxu1 %v768_v22  ;;  %v3174_v27 = vpop.f32.mrb[24].mxu1 }
 0x15d   : > { %v628_v28 = vpop.f32.mrb[25].mxu0  ;;  %1004 = vmatmul.mubr.f32.gmra.mrb[54].mxu1 %v767_v23  ;;  %v3176_v29 = vpop.f32.mrb[25].mxu1  ;;  %v769_v33 = vmax.f32 %v626_v25, 0.0  ;;  %v801_v10 = vmax.f32 %v3174_v27, 0.0 }
 0x15e   : > { %v770_v31 = vmax.f32 %v628_v28, 0.0  ;;  %v802_v54 = vmax.f32 %v3176_v29, 0.0 }
 0x160   : > { %v632_v34 = vpop.f32.mrb[26].mxu0  ;;  %1009 = vmatprep.mubr.f32.mxu1 %v770_v31  ;;  %v3178_v35 = vpop.f32.mrb[26].mxu1 }
 0x161   : > { %v634_v37 = vpop.f32.mrb[27].mxu0  ;;  %1010 = vmatmul.mubr.f32.gmra.mrb[56].mxu1 %v769_v33  ;;  %v3180_v39 = vpop.f32.mrb[27].mxu1  ;;  %v771_v41 = vmax.f32 %v632_v34, 0.0  ;;  %v803_v11 = vmax.f32 %v3178_v35, 0.0 }
 0x162   : > { %v772_v40 = vmax.f32 %v634_v37, 0.0  ;;  %v804_v60 = vmax.f32 %v3180_v39, 0.0 }
 0x164   : > { %v638_v43 = vpop.f32.mrb[28].mxu0  ;;  %1015 = vmatprep.mubr.f32.mxu1 %v772_v40  ;;  %v3182_v45 = vpop.f32.mrb[28].mxu1 }
 0x165   : > { %v640_v46 = vpop.f32.mrb[29].mxu0  ;;  %1016 = vmatmul.mubr.f32.gmra.mrb[58].mxu1 %v771_v41  ;;  %v3184_v47 = vpop.f32.mrb[29].mxu1  ;;  %v773_v51 = vmax.f32 %v638_v43, 0.0  ;;  %v805_v13 = vmax.f32 %v3182_v45, 0.0 }
 0x166   : > { %v774_v49 = vmax.f32 %v640_v46, 0.0  ;;  %v806_v3 = vmax.f32 %v3184_v47, 0.0 }
 0x168   : > { %v644_v52 = vpop.f32.mrb[30].mxu0  ;;  %1021 = vmatprep.mubr.f32.mxu1 %v774_v49  ;;  %v3186_v53 = vpop.f32.mrb[30].mxu1 }
 0x169   : > { %v646_v55 = vpop.f32.mrb[31].mxu0  ;;  %1022 = vmatmul.mubr.f32.gmra.mrb[60].mxu1 %v773_v51  ;;  %v3188_v57 = vpop.f32.mrb[31].mxu1  ;;  %v775_v61 = vmax.f32 %v644_v52, 0.0  ;;  %v807_v15 = vmax.f32 %v3186_v53, 0.0 }
 0x16a   : > { %v776_v58 = vmax.f32 %v646_v55, 0.0  ;;  %v808_v9 = vmax.f32 %v3188_v57, 0.0 }
 0x16c   : > { %1027 = vmatprep.mubr.f32.mxu1 %v776_v58 }
 0x16d   : > { %1028 = vmatmul.mubr.f32.gmra.mrb[62].mxu1 %v775_v61 }
 0x16e   : > { %1033 = vmatprep.mubr.f32.mxu1 %v778_v59 }
 0x171   : > { %1034 = vmatmul.mubr.f32.gmra.mrb[64].mxu1 %v777_v1 }
 0x172   : > { %1039 = vmatprep.mubr.f32.mxu1 %v780_v63 }
 0x175   : > { %1040 = vmatmul.mubr.f32.gmra.mrb[66].mxu1 %v779_v4 }
 0x176   : > { %1045 = vmatprep.mubr.f32.mxu1 %v782_v2 }
 0x179   : > { %1046 = vmatmul.mubr.f32.gmra.mrb[68].mxu1 %v781_v14 }
 0x17a   : > { %1051 = vmatprep.mubr.f32.mxu1 %v784_v6 }
 0x17d   : > { %1052 = vmatmul.mubr.f32.gmra.mrb[70].mxu1 %v783_v20 }
 0x17e   : > { %1057 = vmatprep.mubr.f32.mxu1 %v786_v7 }
 0x181   : > { %1058 = vmatmul.mubr.f32.gmra.mrb[72].mxu1 %v785_v26 }
 0x182   : > { %1063 = vmatprep.mubr.f32.mxu1 %v788_v12 }
 0x185   : > { %1064 = vmatmul.mubr.f32.gmra.mrb[74].mxu1 %v787_v32 }
 0x186   : > { %1069 = vmatprep.mubr.f32.mxu1 %v790_v18 }
 0x189   : > { %1070 = vmatmul.mubr.f32.gmra.mrb[76].mxu1 %v789_v38 }
 0x18a   : > { %1075 = vmatprep.mubr.f32.mxu1 %v792_v24 }
 0x18d   : > { %1076 = vmatmul.mubr.f32.gmra.mrb[78].mxu1 %v791_v36 }
 0x18e   : > { %1081 = vmatprep.mubr.f32.mxu1 %v794_v30 }
 0x191   : > { %1082 = vmatmul.mubr.f32.gmra.mrb[80].mxu1 %v793_v42 }
 0x192   : > { %1087 = vmatprep.mubr.f32.mxu1 %v796_v44 }
 0x195   : > { %1088 = vmatmul.mubr.f32.gmra.mrb[82].mxu1 %v795_v48 }
 0x196   : > { %1093 = vmatprep.mubr.f32.mxu1 %v798_v50 }
 0x199   : > { %1094 = vmatmul.mubr.f32.gmra.mrb[84].mxu1 %v797_v62 }
 0x19a   : > { %1099 = vmatprep.mubr.f32.mxu1 %v800_v56 }
 0x19d   : > { %1100 = vmatmul.mubr.f32.gmra.mrb[86].mxu1 %v799_v5 }
 0x19e   : > { %1105 = vmatprep.mubr.f32.mxu1 %v802_v54 }
 0x1a1   : > { %1106 = vmatmul.mubr.f32.gmra.mrb[88].mxu1 %v801_v10 }
 0x1a2   : > { %1111 = vmatprep.mubr.f32.mxu1 %v804_v60 }
 0x1a5   : > { %1112 = vmatmul.mubr.f32.gmra.mrb[90].mxu1 %v803_v11 }
 0x1a6   : > { %1117 = vmatprep.mubr.f32.mxu1 %v806_v3 }
 0x1a9   : > { %1118 = vmatmul.mubr.f32.gmra.mrb[92].mxu1 %v805_v13 }
 0x1aa   : > { %1123 = vmatprep.mubr.f32.mxu1 %v808_v9 }
 0x1ad   : > { %1124 = vmatmul.mubr.f32.gmra.mrb[94].mxu1 %v807_v15 }
 0x1ae   : > { %1483 = vmatprep.mubr.f32.mxu1 %v4208_v0  ;;  %v3493_v0 = vld [vmem:[%s4197_s1 + $0xf0] sm:$0xff] }
 0x1af   : > { %4276 = vst [vmem:[#allocation23_spill] sm:$0xff] %v3493_v0 }
 0x204   : > { %v939_v17 = vpop.f32.mrb[32].mxu1 }
 0x205   : > { %v3230_v19 = vpop.f32.mrb[33].mxu1 }
 0x208   : > { %v945_v21 = vpop.f32.mrb[34].mxu1 }
 0x209   : > { %v2355_v22 = vpack.c.bf16 %v945_v21, %v939_v17  ;;  %v3232_v23 = vpop.f32.mrb[35].mxu1 }
 0x20b   : > { %2356 = vmatpush1.bf16.msra.mxu0 %v2355_v22 }
 0x20c   : > { %v951_v25 = vpop.f32.mrb[36].mxu1  ;;  %2357 = vmatprep.subr.bf16.mxu0 %v4206_v8 }
 0x20d   : > { %v3235_v27 = vpop.f32.mrb[37].mxu1 }
 0x210   : > { %v957_v28 = vpop.f32.mrb[38].mxu1 }
 0x211   : > { %v2358_v29 = vpack.c.bf16 %v957_v28, %v951_v25  ;;  %v3237_v31 = vpop.f32.mrb[39].mxu1 }
 0x213   : > { %2359 = vmatpush1.bf16.msra.mxu0 %v2358_v29 }
 0x214   : > { %v963_v33 = vpop.f32.mrb[40].mxu1  ;;  %2360 = vmatprep.subr.bf16.mxu0 %v4206_v8 }
 0x215   : > { %v3240_v34 = vpop.f32.mrb[41].mxu1 }
 0x218   : > { %v969_v35 = vpop.f32.mrb[42].mxu1 }
 0x219   : > { %v2361_v37 = vpack.c.bf16 %v969_v35, %v963_v33  ;;  %v3242_v39 = vpop.f32.mrb[43].mxu1 }
 0x21b   : > { %2362 = vmatpush1.bf16.msra.mxu0 %v2361_v37 }
 0x21c   : > { %v975_v40 = vpop.f32.mrb[44].mxu1  ;;  %2363 = vmatprep.subr.bf16.mxu0 %v4206_v8 }
 0x21d   : > { %v3245_v41 = vpop.f32.mrb[45].mxu1 }
 0x220   : > { %v981_v43 = vpop.f32.mrb[46].mxu1 }
 0x221   : > { %v2364_v45 = vpack.c.bf16 %v981_v43, %v975_v40  ;;  %v3247_v46 = vpop.f32.mrb[47].mxu1 }
 0x223   : > { %2365 = vmatpush1.bf16.msra.mxu0 %v2364_v45 }
 0x224   : > { %v987_v47 = vpop.f32.mrb[48].mxu1  ;;  %2366 = vmatprep.subr.bf16.mxu0 %v4206_v8 }
 0x225   : > { %v3250_v49 = vpop.f32.mrb[49].mxu1 }
 0x228   : > { %v993_v51 = vpop.f32.mrb[50].mxu1 }
 0x229   : > { %v2367_v52 = vpack.c.bf16 %v993_v51, %v987_v47  ;;  %v3252_v53 = vpop.f32.mrb[51].mxu1 }
 0x22b   : > { %2368 = vmatpush1.bf16.msra.mxu0 %v2367_v52 }
 0x22c   : > { %v999_v55 = vpop.f32.mrb[52].mxu1  ;;  %2369 = vmatprep.subr.bf16.mxu0 %v4206_v8 }
 0x22d   : > { %v3255_v57 = vpop.f32.mrb[53].mxu1 }
 0x230   : > { %v1005_v58 = vpop.f32.mrb[54].mxu1 }
 0x231   : > { %v2370_v59 = vpack.c.bf16 %v1005_v58, %v999_v55  ;;  %v3257_v61 = vpop.f32.mrb[55].mxu1 }
 0x233   : > { %2371 = vmatpush1.bf16.msra.mxu0 %v2370_v59 }
 0x234   : > { %v1011_v63 = vpop.f32.mrb[56].mxu1  ;;  %2372 = vmatprep.subr.bf16.mxu0 %v4206_v8 }
 0x235   : > { %v3260_v1 = vpop.f32.mrb[57].mxu1 }
 0x238   : > { %v1017_v2 = vpop.f32.mrb[58].mxu1 }
 0x239   : > { %v2373_v4 = vpack.c.bf16 %v1017_v2, %v1011_v63  ;;  %v3262_v6 = vpop.f32.mrb[59].mxu1  ;;  %v3312_v2 = vld [vmem:[%s4197_s1] sm:$0xff] }
 0x23b   : > { %2374 = vmatpush1.bf16.msra.mxu0 %v2373_v4  ;;  %v3317_v4 = vld [vmem:[%s4197_s1 + $0x18] sm:$0xff] }
 0x23c   : > { %v1023_v14 = vpop.f32.mrb[60].mxu1  ;;  %2375 = vmatprep.subr.bf16.mxu0 %v4206_v8 }
 0x23d   : > { %v3265_v7 = vpop.f32.mrb[61].mxu1 }
 0x240   : > { %v1029_v20 = vpop.f32.mrb[62].mxu1 }
 0x241   : > { %v2376_v12 = vpack.c.bf16 %v1029_v20, %v1023_v14  ;;  %v3267_v26 = vpop.f32.mrb[63].mxu1  ;;  %v1388_v14 = vld [vmem:[#allocation5 + $0x8] sm:$0xff]  ;;  %v1390_v20 = vld [vmem:[#allocation5 + $0x18] sm:$0xff] }
 0x243   : > { %2377 = vmatpush1.bf16.msra.mxu0 %v2376_v12  ;;  %v1387_v12 = vld [vmem:[#allocation5] sm:$0xff] }
 0x244   : > { %v1035_v18 = vpop.f32.mrb[64].mxu1  ;;  %2378 = vmatprep.subr.bf16.mxu0 %v4206_v8 }
 0x245   : > { %v3270_v32 = vpop.f32.mrb[65].mxu1 }
 0x248   : > { %v1041_v24 = vpop.f32.mrb[66].mxu1 }
 0x249   : > { %v2379_v38 = vpack.c.bf16 %v1041_v24, %v1035_v18  ;;  %v3272_v30 = vpop.f32.mrb[67].mxu1  ;;  %v2402_v18 = vpack.c.bf16 %v1390_v20, %v1388_v14  ;;  %v1389_v24 = vld [vmem:[#allocation5 + $0x10] sm:$0xff]  ;;  %v1404_v14 = vld [vmem:[#allocation5 + $0x88] sm:$0xff]  ;;  %v1406_v20 = vld [vmem:[#allocation5 + $0x98] sm:$0xff] }
 0x24b   : > { %2380 = vmatpush1.bf16.msra.mxu0 %v2379_v38  ;;  %v1392_v38 = vld [vmem:[#allocation5 + $0x28] sm:$0xff]  ;;  %2403 = vmatprep.subr.bf16.mxu1 %v2402_v18  ;;  %v3349_v18 = vld [vmem:[%s4197_s1 + $0x30] sm:$0xff] }
 0x24c   : > { %v1047_v36 = vpop.f32.mrb[68].mxu1  ;;  %2381 = vmatprep.subr.bf16.mxu0 %v4206_v8 }
 0x24d   : > { %v3275_v44 = vpop.f32.mrb[69].mxu1 }
 0x250   : > { %v1053_v42 = vpop.f32.mrb[70].mxu1 }
 0x251   : > { %v2382_v50 = vpack.c.bf16 %v1053_v42, %v1047_v36  ;;  %v3277_v48 = vpop.f32.mrb[71].mxu1  ;;  %v1394_v36 = vld [vmem:[#allocation5 + $0x38] sm:$0xff]  ;;  %v2404_v42 = vpack.c.bf16 %v1389_v24, %v1387_v12  ;;  %v2418_v24 = vpack.c.bf16 %v1406_v20, %v1404_v14  ;;  %v3378_v14 = vld [vmem:[%s4197_s1 + $0x68] sm:$0xff] }
 0x253   : > { %2383 = vmatpush1.bf16.msra.mxu0 %v2382_v50  ;;  %v2406_v50 = vpack.c.bf16 %v1394_v36, %v1392_v38  ;;  %2405 = vmatpush1.bf16.msra.mxu1 %v2404_v42  ;;  %v1403_v38 = vld [vmem:[#allocation5 + $0x80] sm:$0xff]  ;;  %v1405_v36 = vld [vmem:[#allocation5 + $0x90] sm:$0xff]  ;;  %v3354_v42 = vld [vmem:[%s4197_s1 + $0x48] sm:$0xff] }
 0x254   : > { %v1059_v56 = vpop.f32.mrb[72].mxu1  ;;  %2384 = vmatprep.subr.bf16.mxu0 %v4206_v8 }
 0x255   : > { %v3280_v62 = vpop.f32.mrb[73].mxu1  ;;  %2407 = vmatprep.subr.bf16.mxu1 %v2406_v50  ;;  %v1408_v50 = vld [vmem:[#allocation5 + $0xa8] sm:$0xff] }
 0x258   : > { %v1065_v54 = vpop.f32.mrb[74].mxu1 }
 0x259   : > { %v2385_v5 = vpack.c.bf16 %v1065_v54, %v1059_v56  ;;  %v3282_v60 = vpop.f32.mrb[75].mxu1  ;;  %v1391_v56 = vld [vmem:[#allocation5 + $0x20] sm:$0xff]  ;;  %v1393_v54 = vld [vmem:[#allocation5 + $0x30] sm:$0xff] }
 0x25b   : > { %2386 = vmatpush1.bf16.msra.mxu0 %v2385_v5  ;;  %v1396_v5 = vld [vmem:[#allocation5 + $0x48] sm:$0xff] }
 0x25c   : > { %v1071_v10 = vpop.f32.mrb[76].mxu1  ;;  %2387 = vmatprep.subr.bf16.mxu0 %v4206_v8 }
 0x25d   : > { %v3285_v3 = vpop.f32.mrb[77].mxu1 }
 0x260   : > { %v1077_v11 = vpop.f32.mrb[78].mxu1 }
 0x261   : > { %v2388_v9 = vpack.c.bf16 %v1077_v11, %v1071_v10  ;;  %v3287_v13 = vpop.f32.mrb[79].mxu1  ;;  %v1398_v10 = vld [vmem:[#allocation5 + $0x58] sm:$0xff]  ;;  %v2408_v11 = vpack.c.bf16 %v1393_v54, %v1391_v56  ;;  %v2420_v54 = vpack.c.bf16 %v1405_v36, %v1403_v38  ;;  %v3397_v38 = vld [vmem:[%s4197_s1 + $0x70] sm:$0xff]  ;;  %v3402_v36 = vld [vmem:[%s4197_s1 + $0x88] sm:$0xff] }
 0x262   : > { %v1410_v56 = vld [vmem:[#allocation5 + $0xb8] sm:$0xff] }
 0x263   : > { %2389 = vmatpush1.bf16.msra.mxu0 %v2388_v9  ;;  %v3325_v9 = vld [vmem:[%s4197_s1 + $0x10] sm:$0xff]  ;;  %2409 = vmatpush1.bf16.msra.mxu1 %v2408_v11  ;;  %v1407_v11 = vld [vmem:[#allocation5 + $0xa0] sm:$0xff] }
 0x264   : > { %v1083_v15 = vpop.f32.mrb[80].mxu1  ;;  %2390 = vmatprep.subr.bf16.mxu0 %v4206_v8 }
 0x265   : > { %v3290_v17 = vpop.f32.mrb[81].mxu1 }
 0x268   : > { %v1089_v21 = vpop.f32.mrb[82].mxu1 }
 0x269   : > { %v2391_v22 = vpack.c.bf16 %v1089_v21, %v1083_v15  ;;  %v3292_v25 = vpop.f32.mrb[83].mxu1  ;;  %v2410_v15 = vpack.c.bf16 %v1398_v10, %v1396_v5  ;;  %v1395_v21 = vld [vmem:[#allocation5 + $0x40] sm:$0xff]  ;;  %v2422_v10 = vpack.c.bf16 %v1410_v56, %v1408_v50  ;;  %v3414_v56 = vld [vmem:[%s4197_s1 + $0x98] sm:$0xff] }
 0x26a   : > { %v3361_v5 = vld [vmem:[%s4197_s1 + $0x40] sm:$0xff] }
 0x26b   : > { %2392 = vmatpush1.bf16.msra.mxu0 %v2391_v22  ;;  %v1397_v22 = vld [vmem:[#allocation5 + $0x50] sm:$0xff]  ;;  %2411 = vmatprep.subr.bf16.mxu1 %v2410_v15  ;;  %v3409_v50 = vld [vmem:[%s4197_s1 + $0x80] sm:$0xff] }
 0x26c   : > { %v1095_v28 = vpop.f32.mrb[84].mxu1  ;;  %2393 = vmatprep.subr.bf16.mxu0 %v4206_v8  ;;  %v1409_v15 = vld [vmem:[#allocation5 + $0xb0] sm:$0xff] }
 0x26d   : > { %v3295_v29 = vpop.f32.mrb[85].mxu1 }
 0x270   : > { %v1101_v33 = vpop.f32.mrb[86].mxu1 }
 0x271   : > { %v2394_v35 = vpack.c.bf16 %v1101_v33, %v1095_v28  ;;  %v3297_v37 = vpop.f32.mrb[87].mxu1  ;;  %v3330_v28 = vld [vmem:[%s4197_s1 + $0x28] sm:$0xff] }
 0x272   : > { %v1400_v33 = vld [vmem:[#allocation5 + $0x68] sm:$0xff] }
 0x273   : > { %2395 = vmatpush1.bf16.msra.mxu0 %v2394_v35  ;;  %v1402_v35 = vld [vmem:[#allocation5 + $0x78] sm:$0xff] }
 0x274   : > { %v1107_v40 = vpop.f32.mrb[88].mxu1  ;;  %2396 = vmatprep.subr.bf16.mxu0 %v4206_v8 }
 0x275   : > { %v3300_v43 = vpop.f32.mrb[89].mxu1 }
 0x278   : > { %v1113_v45 = vpop.f32.mrb[90].mxu1 }
 0x279   : > { %v2397_v47 = vpack.c.bf16 %v1113_v45, %v1107_v40  ;;  %v3302_v51 = vpop.f32.mrb[91].mxu1  ;;  %v2412_v40 = vpack.c.bf16 %v1397_v22, %v1395_v21  ;;  %v3337_v45 = vld [vmem:[%s4197_s1 + $0x20] sm:$0xff]  ;;  %v3366_v21 = vld [vmem:[%s4197_s1 + $0x58] sm:$0xff]  ;;  %v1412_v22 = vld [vmem:[#allocation5 + $0xc8] sm:$0xff] }
 0x27b   : > { %2398 = vmatpush1.bf16.msra.mxu0 %v2397_v47  ;;  %v2414_v47 = vpack.c.bf16 %v1402_v35, %v1400_v33  ;;  %2413 = vmatpush1.bf16.msra.mxu1 %v2412_v40  ;;  %v1414_v33 = vld [vmem:[#allocation5 + $0xd8] sm:$0xff]  ;;  %v2424_v35 = vpack.c.bf16 %v1409_v15, %v1407_v11  ;;  %v3373_v40 = vld [vmem:[%s4197_s1 + $0x50] sm:$0xff]  ;;  %v3433_v11 = vld [vmem:[%s4197_s1 + $0xa0] sm:$0xff] }
 0x27c   : > { %v1119_v52 = vpop.f32.mrb[92].mxu1  ;;  %2399 = vmatprep.subr.bf16.mxu0 %v4206_v8  ;;  %4266 = vst [vmem:[#allocation13_spill] sm:$0xff] %v3433_v11  ;;  %v3438_v15 = vld [vmem:[%s4197_s1 + $0xb8] sm:$0xff] }
 0x27d   : > { %v3305_v55 = vpop.f32.mrb[93].mxu1  ;;  %2415 = vmatprep.subr.bf16.mxu1 %v2414_v47  ;;  %v2426_v47 = vpack.c.bf16 %v1414_v33, %v1412_v22  ;;  %4267 = vst [vmem:[#allocation14_spill] sm:$0xff] %v3438_v15  ;;  %v3445_v22 = vld [vmem:[%s4197_s1 + $0xb0] sm:$0xff]  ;;  %v3450_v33 = vld [vmem:[%s4197_s1 + $0xc8] sm:$0xff] }
 0x27e   : > { %4268 = vst [vmem:[#allocation15_spill] sm:$0xff] %v3445_v22  ;;  %4269 = vst [vmem:[#allocation16_spill] sm:$0xff] %v3450_v33 }
 0x280   : > { %v1125_v58 = vpop.f32.mrb[94].mxu1 }
 0x281   : > { %v2400_v59 = vpack.c.bf16 %v1125_v58, %v1119_v52  ;;  %v3307_v63 = vpop.f32.mrb[95].mxu1  ;;  %v1399_v52 = vld [vmem:[#allocation5 + $0x60] sm:$0xff]  ;;  %v1401_v58 = vld [vmem:[#allocation5 + $0x70] sm:$0xff] }
 0x282   : > { %v2416_v12 = vpack.c.bf16 %v1401_v58, %v1399_v52  ;;  %v1411_v52 = vld [vmem:[#allocation5 + $0xc0] sm:$0xff]  ;;  %v1413_v58 = vld [vmem:[#allocation5 + $0xd0] sm:$0xff] }
 0x283   : > { %2401 = vmatpush1.bf16.msra.mxu0 %v2400_v59  ;;  %v3342_v59 = vld [vmem:[%s4197_s1 + $0x38] sm:$0xff]  ;;  %v2428_v20 = vpack.c.bf16 %v1413_v58, %v1411_v52  ;;  %v3469_v52 = vld [vmem:[%s4197_s1 + $0xd0] sm:$0xff]  ;;  %v3474_v58 = vld [vmem:[%s4197_s1 + $0xe8] sm:$0xff] }
 0x284   : > { %2434 = vmatprep.subr.bf16.mxu0 %v4206_v8  ;;  %2417 = vmatpush1.bf16.msra.mxu1 %v2416_v12  ;;  %v3385_v12 = vld [vmem:[%s4197_s1 + $0x60] sm:$0xff]  ;;  %4272 = vst [vmem:[#allocation19_spill] sm:$0xff] %v3469_v52  ;;  %4273 = vst [vmem:[#allocation20_spill] sm:$0xff] %v3474_v58  ;;  %v3486_v8 = vld [vmem:[%s4197_s1 + $0xf8] sm:$0xff] }
 0x285   : > { %2419 = vmatprep.subr.bf16.mxu1 %v2418_v24  ;;  %v3390_v24 = vld [vmem:[%s4197_s1 + $0x78] sm:$0xff]  ;;  %4275 = vst [vmem:[#allocation22_spill] sm:$0xff] %v3486_v8 }
 0x286   : > { %1195 = vmatmul.mubr.f32.vlgmr.msra.gmra.mrb[32].mxu0 %v3312_v2 }
 0x287   : > { %1199 = vmatprep.mubr.f32.mxu0 %v3317_v4 }
 0x288   : > { %2421 = vmatpush1.bf16.msra.mxu1 %v2420_v54  ;;  %v3421_v54 = vld [vmem:[%s4197_s1 + $0x90] sm:$0xff] }
 0x289   : > { %2423 = vmatprep.subr.bf16.mxu1 %v2422_v10  ;;  %4264 = vst [vmem:[#allocation11_spill] sm:$0xff] %v3421_v54  ;;  %v3426_v10 = vld [vmem:[%s4197_s1 + $0xa8] sm:$0xff] }
 0x28a   : > { %1200 = vmatmul.mubr.f32.gmra.mrb[34].mxu0 %v3325_v9  ;;  %4265 = vst [vmem:[#allocation12_spill] sm:$0xff] %v3426_v10 }
 0x28b   : > { %1204 = vmatprep.mubr.f32.mxu0 %v3330_v28 }
 0x28c   : > { %2425 = vmatpush1.bf16.msra.mxu1 %v2424_v35  ;;  %v3457_v35 = vld [vmem:[%s4197_s1 + $0xc0] sm:$0xff] }
 0x28d   : > { %2427 = vmatprep.subr.bf16.mxu1 %v2426_v47  ;;  %4270 = vst [vmem:[#allocation17_spill] sm:$0xff] %v3457_v35  ;;  %v3462_v47 = vld [vmem:[%s4197_s1 + $0xd8] sm:$0xff] }
 0x28e   : > { %1205 = vmatmul.mubr.f32.gmra.mrb[36].mxu0 %v3337_v45  ;;  %4271 = vst [vmem:[#allocation18_spill] sm:$0xff] %v3462_v47 }
 0x28f   : > { %1209 = vmatprep.mubr.f32.mxu0 %v3342_v59 }
 0x290   : > { %2429 = vmatpush1.bf16.msra.mxu1 %v2428_v20  ;;  %v3481_v20 = vld [vmem:[%s4197_s1 + $0xe0] sm:$0xff] }
 0x291   : > { %4274 = vst [vmem:[#allocation21_spill] sm:$0xff] %v3481_v20 }
 0x292   : > { %1210 = vmatmul.mubr.f32.gmra.mrb[38].mxu0 %v3349_v18 }
 0x293   : > { %1214 = vmatprep.mubr.f32.mxu0 %v3354_v42 }
 0x296   : > { %1215 = vmatmul.mubr.f32.gmra.mrb[40].mxu0 %v3361_v5 }
 0x297   : > { %1219 = vmatprep.mubr.f32.mxu0 %v3366_v21 }
 0x29a   : > { %1220 = vmatmul.mubr.f32.gmra.mrb[42].mxu0 %v3373_v40 }
 0x29b   : > { %1224 = vmatprep.mubr.f32.mxu0 %v3378_v14 }
 0x29e   : > { %1225 = vmatmul.mubr.f32.gmra.mrb[44].mxu0 %v3385_v12 }
 0x29f   : > { %1229 = vmatprep.mubr.f32.mxu0 %v3390_v24 }
 0x2a2   : > { %1230 = vmatmul.mubr.f32.gmra.mrb[46].mxu0 %v3397_v38 }
 0x2a3   : > { %1234 = vmatprep.mubr.f32.mxu0 %v3402_v36 }
 0x2a6   : > { %1235 = vmatmul.mubr.f32.gmra.mrb[48].mxu0 %v3409_v50 }
 0x2a7   : > { %1239 = vmatprep.mubr.f32.mxu0 %v3414_v56 }
 0x2aa   : > { %1240 = vmatmul.mubr.f32.gmra.mrb[50].mxu0 %v3421_v54 }
 0x2ab   : > { %1244 = vmatprep.mubr.f32.mxu0 %v3426_v10 }
 0x2ae   : > { %1245 = vmatmul.mubr.f32.gmra.mrb[52].mxu0 %v3433_v11 }
 0x2af   : > { %1249 = vmatprep.mubr.f32.mxu0 %v3438_v15 }
 0x2b2   : > { %1250 = vmatmul.mubr.f32.gmra.mrb[54].mxu0 %v3445_v22  ;;  %v1417_v22 = vld [vmem:[#allocation5 + $0xf0] sm:$0xff] }
 0x2b3   : > { %1254 = vmatprep.mubr.f32.mxu0 %v3450_v33  ;;  %v1415_v33 = vld [vmem:[#allocation5 + $0xe0] sm:$0xff] }
 0x2b4   : > { %v2432_v15 = vpack.c.bf16 %v1417_v22, %v1415_v33  ;;  %v3589_v22 = vld [vmem:[%s4197_s1 + $0x170] sm:$0xff]  ;;  %v3594_v33 = vld [vmem:[%s4197_s1 + $0x188] sm:$0xff] }
 0x2b5   : > { %4292 = vst [vmem:[#allocation39_spill] sm:$0xff] %v3589_v22  ;;  %4293 = vst [vmem:[#allocation40_spill] sm:$0xff] %v3594_v33 }
 0x2b6   : > { %1255 = vmatmul.mubr.f32.gmra.mrb[56].mxu0 %v3457_v35 }
 0x2b7   : > { %1259 = vmatprep.mubr.f32.mxu0 %v3462_v47  ;;  %v3570_v47 = vld [vmem:[%s4197_s1 + $0x168] sm:$0xff] }
 0x2b8   : > { %4289 = vst [vmem:[#allocation36_spill] sm:$0xff] %v3570_v47 }
 0x2ba   : > { %1260 = vmatmul.mubr.f32.gmra.mrb[58].mxu0 %v3469_v52  ;;  %v1418_v52 = vld [vmem:[#allocation5 + $0xf8] sm:$0xff] }
 0x2bb   : > { %1264 = vmatprep.mubr.f32.mxu0 %v3474_v58  ;;  %v3498_v58 = vld [vmem:[%s4197_s1 + $0x108] sm:$0xff] }
 0x2bc   : > { %4277 = vst [vmem:[#allocation24_spill] sm:$0xff] %v3498_v58 }
 0x2be   : > { %1265 = vmatmul.mubr.f32.gmra.mrb[60].mxu0 %v3481_v20  ;;  %v3505_v20 = vld [vmem:[%s4197_s1 + $0x100] sm:$0xff] }
 0x2bf   : > { %1269 = vmatprep.mubr.f32.mxu0 %v3486_v8  ;;  %4278 = vst [vmem:[#allocation25_spill] sm:$0xff] %v3505_v20  ;;  %v3510_v8 = vld [vmem:[%s4197_s1 + $0x118] sm:$0xff] }
 0x2c0   : > { %4279 = vst [vmem:[#allocation26_spill] sm:$0xff] %v3510_v8 }
 0x2c2   : > { %1270 = vmatmul.mubr.f32.gmra.mrb[62].mxu0 %v3493_v0  ;;  %v3517_v0 = vld [vmem:[%s4197_s1 + $0x110] sm:$0xff] }
 0x2c3   : > { %1274 = vmatprep.mubr.f32.mxu0 %v3498_v58  ;;  %4280 = vst [vmem:[#allocation27_spill] sm:$0xff] %v3517_v0  ;;  %v3522_v58 = vld [vmem:[%s4197_s1 + $0x128] sm:$0xff] }
 0x2c4   : > { %4281 = vst [vmem:[#allocation28_spill] sm:$0xff] %v3522_v58 }
 0x2c6   : > { %1275 = vmatmul.mubr.f32.gmra.mrb[64].mxu0 %v3505_v20  ;;  %v3529_v20 = vld [vmem:[%s4197_s1 + $0x120] sm:$0xff] }
 0x2c7   : > { %1279 = vmatprep.mubr.f32.mxu0 %v3510_v8  ;;  %4282 = vst [vmem:[#allocation29_spill] sm:$0xff] %v3529_v20  ;;  %v3534_v8 = vld [vmem:[%s4197_s1 + $0x138] sm:$0xff] }
 0x2c8   : > { %4283 = vst [vmem:[#allocation30_spill] sm:$0xff] %v3534_v8 }
 0x2ca   : > { %1280 = vmatmul.mubr.f32.gmra.mrb[66].mxu0 %v3517_v0  ;;  %v3541_v0 = vld [vmem:[%s4197_s1 + $0x130] sm:$0xff] }
 0x2cb   : > { %1284 = vmatprep.mubr.f32.mxu0 %v3522_v58  ;;  %4284 = vst [vmem:[#allocation31_spill] sm:$0xff] %v3541_v0  ;;  %v3546_v58 = vld [vmem:[%s4197_s1 + $0x148] sm:$0xff] }
 0x2cc   : > { %4285 = vst [vmem:[#allocation32_spill] sm:$0xff] %v3546_v58 }
 0x2ce   : > { %1285 = vmatmul.mubr.f32.gmra.mrb[68].mxu0 %v3529_v20  ;;  %v3553_v20 = vld [vmem:[%s4197_s1 + $0x140] sm:$0xff] }
 0x2cf   : > { %1289 = vmatprep.mubr.f32.mxu0 %v3534_v8  ;;  %4286 = vst [vmem:[#allocation33_spill] sm:$0xff] %v3553_v20  ;;  %v3558_v8 = vld [vmem:[%s4197_s1 + $0x158] sm:$0xff] }
 0x2d0   : > { %4287 = vst [vmem:[#allocation34_spill] sm:$0xff] %v3558_v8 }
 0x2d2   : > { %1290 = vmatmul.mubr.f32.gmra.mrb[70].mxu0 %v3541_v0  ;;  %v3565_v0 = vld [vmem:[%s4197_s1 + $0x150] sm:$0xff] }
 0x2d3   : > { %1294 = vmatprep.mubr.f32.mxu0 %v3546_v58  ;;  %4288 = vst [vmem:[#allocation35_spill] sm:$0xff] %v3565_v0  ;;  %v1416_v58 = vld [vmem:[#allocation5 + $0xe8] sm:$0xff] }
 0x2d4   : > { %v2430_v35 = vpack.c.bf16 %v1418_v52, %v1416_v58  ;;  %v3613_v52 = vld [vmem:[%s4197_s1 + $0x190] sm:$0xff]  ;;  %v3618_v58 = vld [vmem:[%s4197_s1 + $0x1a8] sm:$0xff] }
 0x2d5   : > { %4296 = vst [vmem:[#allocation43_spill] sm:$0xff] %v3613_v52  ;;  %4297 = vst [vmem:[#allocation44_spill] sm:$0xff] %v3618_v58 }
 0x2d6   : > { %1295 = vmatmul.mubr.f32.gmra.mrb[72].mxu0 %v3553_v20  ;;  %2431 = vmatprep.subr.bf16.mxu1 %v2430_v35  ;;  %v3582_v20 = vld [vmem:[%s4197_s1 + $0x178] sm:$0xff] }
 0x2d7   : > { %1299 = vmatprep.mubr.f32.mxu0 %v3558_v8  ;;  %v3577_v8 = vld [vmem:[%s4197_s1 + $0x160] sm:$0xff]  ;;  %2433 = vmatpush1.bf16.msra.mxu1 %v2432_v15  ;;  %4291 = vst [vmem:[#allocation38_spill] sm:$0xff] %v3582_v20  ;;  %v3606_v35 = vld [vmem:[%s4197_s1 + $0x198] sm:$0xff] }
 0x2d8   : > { %4290 = vst [vmem:[#allocation37_spill] sm:$0xff] %v3577_v8  ;;  %v3601_v15 = vld [vmem:[%s4197_s1 + $0x180] sm:$0xff]  ;;  %4295 = vst [vmem:[#allocation42_spill] sm:$0xff] %v3606_v35 }
 0x2d9   : > { %4294 = vst [vmem:[#allocation41_spill] sm:$0xff] %v3601_v15 }
 0x2da   : > { %1300 = vmatmul.mubr.f32.gmra.mrb[74].mxu0 %v3565_v0 }
 0x2db   : > { %1304 = vmatprep.mubr.f32.mxu0 %v3570_v47 }
 0x2de   : > { %1305 = vmatmul.mubr.f32.gmra.mrb[76].mxu0 %v3577_v8 }
 0x2df   : > { %1309 = vmatprep.mubr.f32.mxu0 %v3582_v20 }
 0x2e2   : > { %1310 = vmatmul.mubr.f32.gmra.mrb[78].mxu0 %v3589_v22 }
 0x2e3   : > { %1314 = vmatprep.mubr.f32.mxu0 %v3594_v33 }
 0x2e6   : > { %1315 = vmatmul.mubr.f32.gmra.mrb[80].mxu0 %v3601_v15  ;;  %v3625_v15 = vld [vmem:[%s4197_s1 + $0x1a0] sm:$0xff] }
 0x2e7   : > { %1319 = vmatprep.mubr.f32.mxu0 %v3606_v35  ;;  %4298 = vst [vmem:[#allocation45_spill] sm:$0xff] %v3625_v15  ;;  %v3630_v35 = vld [vmem:[%s4197_s1 + $0x1b8] sm:$0xff] }
 0x2e8   : > { %4299 = vst [vmem:[#allocation46_spill] sm:$0xff] %v3630_v35 }
 0x2ea   : > { %1320 = vmatmul.mubr.f32.gmra.mrb[82].mxu0 %v3613_v52  ;;  %v3637_v52 = vld [vmem:[%s4197_s1 + $0x1b0] sm:$0xff] }
 0x2eb   : > { %1324 = vmatprep.mubr.f32.mxu0 %v3618_v58  ;;  %4300 = vst [vmem:[#allocation47_spill] sm:$0xff] %v3637_v52  ;;  %v3642_v58 = vld [vmem:[%s4197_s1 + $0x1c8] sm:$0xff] }
 0x2ec   : > { %4301 = vst [vmem:[#allocation48_spill] sm:$0xff] %v3642_v58 }
 0x2ee   : > { %1325 = vmatmul.mubr.f32.gmra.mrb[84].mxu0 %v3625_v15  ;;  %v3649_v15 = vld [vmem:[%s4197_s1 + $0x1c0] sm:$0xff] }
 0x2ef   : > { %1329 = vmatprep.mubr.f32.mxu0 %v3630_v35  ;;  %4302 = vst [vmem:[#allocation49_spill] sm:$0xff] %v3649_v15  ;;  %v3654_v35 = vld [vmem:[%s4197_s1 + $0x1d8] sm:$0xff] }
 0x2f0   : > { %4303 = vst [vmem:[#allocation50_spill] sm:$0xff] %v3654_v35 }
 0x2f2   : > { %1330 = vmatmul.mubr.f32.gmra.mrb[86].mxu0 %v3637_v52  ;;  %v3661_v52 = vld [vmem:[%s4197_s1 + $0x1d0] sm:$0xff] }
 0x2f3   : > { %1334 = vmatprep.mubr.f32.mxu0 %v3642_v58  ;;  %4304 = vst [vmem:[#allocation51_spill] sm:$0xff] %v3661_v52  ;;  %v3666_v58 = vld [vmem:[%s4197_s1 + $0x1e8] sm:$0xff] }
 0x2f4   : > { %4305 = vst [vmem:[#allocation52_spill] sm:$0xff] %v3666_v58 }
 0x2f6   : > { %1335 = vmatmul.mubr.f32.gmra.mrb[88].mxu0 %v3649_v15  ;;  %v3673_v15 = vld [vmem:[%s4197_s1 + $0x1e0] sm:$0xff] }
 0x2f7   : > { %1339 = vmatprep.mubr.f32.mxu0 %v3654_v35  ;;  %4306 = vst [vmem:[#allocation53_spill] sm:$0xff] %v3673_v15  ;;  %v3678_v35 = vld [vmem:[%s4197_s1 + $0x1f8] sm:$0xff] }
 0x2f8   : > { %4307 = vst [vmem:[#allocation54_spill] sm:$0xff] %v3678_v35 }
 0x2fa   : > { %1340 = vmatmul.mubr.f32.gmra.mrb[90].mxu0 %v3661_v52  ;;  %v3685_v52 = vld [vmem:[%s4197_s1 + $0x1f0] sm:$0xff] }
 0x2fb   : > { %1344 = vmatprep.mubr.f32.mxu0 %v3666_v58  ;;  %4308 = vst [vmem:[#allocation55_spill] sm:$0xff] %v3685_v52 }
 0x2fe   : > { %1345 = vmatmul.mubr.f32.gmra.mrb[92].mxu0 %v3673_v15 }
 0x2ff   : > { %1349 = vmatprep.mubr.f32.mxu0 %v3678_v35  ;;  %v4309_v35 = vmov 0.0  }
 0x302   : > { %1350 = vmatmul.mubr.f32.gmra.mrb[94].mxu0 %v3685_v52 }
 0x303   : > { %1740 = vmatprep.mubr.f32.mxu0 %v3227_v16 }
 0x359   : > { %v1196_v58 = vpop.f32.mrb[32].mxu0 }
 0x35a   : > { %v1197_v33 = vadd.f32 %v1196_v58, %v3230_v19  ;;  %v1198_v22 = vpop.f32.mrb[33].mxu0 }
 0x35c   : > { %v1355_v20 = vmax.f32 %v1197_v33, 0.0 }
 0x35d   : > { %v1201_v8 = vpop.f32.mrb[34].mxu0 }
 0x35e   : > { %v1202_v47 = vadd.f32 %v1201_v8, %v3232_v23  ;;  %v1203_v15 = vpop.f32.mrb[35].mxu0  ;;  %1484 = vmatmul.mubr.f32.vlgmr.msra.gmra.mrb[96].mxu1 %v1355_v20 }
 0x35f   : > { %1489 = vmatprep.mubr.f32.mxu1 %v4309_v35 }
 0x360   : > { %v1356_v0 = vmax.f32 %v1202_v47, 0.0 }
 0x361   : > { %v1206_v11 = vpop.f32.mrb[36].mxu0 }
 0x362   : > { %v1207_v10 = vadd.f32 %v1206_v11, %v3235_v27  ;;  %v1208_v54 = vpop.f32.mrb[37].mxu0  ;;  %1490 = vmatmul.mubr.f32.gmra.mrb[98].mxu1 %v1356_v0 }
 0x363   : > { %1495 = vmatprep.mubr.f32.mxu1 %v4309_v35 }
 0x364   : > { %v1357_v16 = vmax.f32 %v1207_v10, 0.0 }
 0x365   : > { %v1211_v52 = vpop.f32.mrb[38].mxu0 }
 0x366   : > { %v1212_v19 = vadd.f32 %v1211_v52, %v3237_v31  ;;  %v1213_v22 = vpop.f32.mrb[39].mxu0  ;;  %1496 = vmatmul.mubr.f32.gmra.mrb[100].mxu1 %v1357_v16 }
 0x367   : > { %1501 = vmatprep.mubr.f32.mxu1 %v4309_v35 }
 0x368   : > { %v1358_v8 = vmax.f32 %v1212_v19, 0.0 }
 0x369   : > { %v1216_v23 = vpop.f32.mrb[40].mxu0 }
 0x36a   : > { %v1217_v20 = vadd.f32 %v1216_v23, %v3240_v34  ;;  %v1218_v47 = vpop.f32.mrb[41].mxu0  ;;  %1502 = vmatmul.mubr.f32.gmra.mrb[102].mxu1 %v1358_v8 }
 0x36b   : > { %1507 = vmatprep.mubr.f32.mxu1 %v4309_v35 }
 0x36c   : > { %v1359_v27 = vmax.f32 %v1217_v20, 0.0 }
 0x36d   : > { %v1221_v0 = vpop.f32.mrb[42].mxu0 }
 0x36e   : > { %v1222_v54 = vadd.f32 %v1221_v0, %v3242_v39  ;;  %v1223_v10 = vpop.f32.mrb[43].mxu0  ;;  %1508 = vmatmul.mubr.f32.gmra.mrb[104].mxu1 %v1359_v27 }
 0x36f   : > { %1513 = vmatprep.mubr.f32.mxu1 %v4309_v35 }
 0x370   : > { %v1360_v31 = vmax.f32 %v1222_v54, 0.0 }
 0x371   : > { %v1226_v11 = vpop.f32.mrb[44].mxu0 }
 0x372   : > { %v1227_v33 = vadd.f32 %v1226_v11, %v3245_v41  ;;  %v1228_v15 = vpop.f32.mrb[45].mxu0  ;;  %1514 = vmatmul.mubr.f32.gmra.mrb[106].mxu1 %v1360_v31 }
 0x373   : > { %1519 = vmatprep.mubr.f32.mxu1 %v4309_v35 }
 0x374   : > { %v1361_v34 = vmax.f32 %v1227_v33, 0.0 }
 0x375   : > { %v1231_v52 = vpop.f32.mrb[46].mxu0 }
 0x376   : > { %v1232_v58 = vadd.f32 %v1231_v52, %v3247_v46  ;;  %v1233_v16 = vpop.f32.mrb[47].mxu0  ;;  %1520 = vmatmul.mubr.f32.gmra.mrb[108].mxu1 %v1361_v34 }
 0x377   : > { %1525 = vmatprep.mubr.f32.mxu1 %v4309_v35 }
 0x378   : > { %v1362_v39 = vmax.f32 %v1232_v58, 0.0 }
 0x379   : > { %v1236_v19 = vpop.f32.mrb[48].mxu0 }
 0x37a   : > { %v1237_v22 = vadd.f32 %v1236_v19, %v3250_v49  ;;  %v1238_v8 = vpop.f32.mrb[49].mxu0  ;;  %1526 = vmatmul.mubr.f32.gmra.mrb[110].mxu1 %v1362_v39 }
 0x37b   : > { %1531 = vmatprep.mubr.f32.mxu1 %v4309_v35 }
 0x37c   : > { %v1363_v41 = vmax.f32 %v1237_v22, 0.0 }
 0x37d   : > { %v1241_v23 = vpop.f32.mrb[50].mxu0 }
 0x37e   : > { %v1242_v20 = vadd.f32 %v1241_v23, %v3252_v53  ;;  %v1243_v47 = vpop.f32.mrb[51].mxu0  ;;  %1532 = vmatmul.mubr.f32.gmra.mrb[112].mxu1 %v1363_v41 }
 0x37f   : > { %1537 = vmatprep.mubr.f32.mxu1 %v4309_v35 }
 0x380   : > { %v1364_v46 = vmax.f32 %v1242_v20, 0.0 }
 0x381   : > { %v1246_v27 = vpop.f32.mrb[52].mxu0 }
 0x382   : > { %v1247_v0 = vadd.f32 %v1246_v27, %v3255_v57  ;;  %v1248_v54 = vpop.f32.mrb[53].mxu0  ;;  %1538 = vmatmul.mubr.f32.gmra.mrb[114].mxu1 %v1364_v46 }
 0x383   : > { %1543 = vmatprep.mubr.f32.mxu1 %v4309_v35 }
 0x384   : > { %v1365_v49 = vmax.f32 %v1247_v0, 0.0 }
 0x385   : > { %v1251_v10 = vpop.f32.mrb[54].mxu0 }
 0x386   : > { %v1252_v31 = vadd.f32 %v1251_v10, %v3257_v61  ;;  %v1253_v11 = vpop.f32.mrb[55].mxu0  ;;  %1544 = vmatmul.mubr.f32.gmra.mrb[116].mxu1 %v1365_v49 }
 0x387   : > { %1549 = vmatprep.mubr.f32.mxu1 %v4309_v35 }
 0x388   : > { %v1366_v53 = vmax.f32 %v1252_v31, 0.0 }
 0x389   : > { %v1256_v33 = vpop.f32.mrb[56].mxu0 }
 0x38a   : > { %v1257_v15 = vadd.f32 %v1256_v33, %v3260_v1  ;;  %v1258_v34 = vpop.f32.mrb[57].mxu0  ;;  %1550 = vmatmul.mubr.f32.gmra.mrb[118].mxu1 %v1366_v53 }
 0x38b   : > { %1555 = vmatprep.mubr.f32.mxu1 %v4309_v35 }
 0x38c   : > { %v1367_v57 = vmax.f32 %v1257_v15, 0.0 }
 0x38d   : > { %v1261_v52 = vpop.f32.mrb[58].mxu0 }
 0x38e   : > { %v1262_v58 = vadd.f32 %v1261_v52, %v3262_v6  ;;  %v1263_v16 = vpop.f32.mrb[59].mxu0  ;;  %1556 = vmatmul.mubr.f32.gmra.mrb[120].mxu1 %v1367_v57 }
 0x38f   : > { %1561 = vmatprep.mubr.f32.mxu1 %v4309_v35 }
 0x390   : > { %v1368_v61 = vmax.f32 %v1262_v58, 0.0 }
 0x391   : > { %v1266_v39 = vpop.f32.mrb[60].mxu0 }
 0x392   : > { %v1267_v19 = vadd.f32 %v1266_v39, %v3265_v7  ;;  %v1268_v22 = vpop.f32.mrb[61].mxu0  ;;  %1562 = vmatmul.mubr.f32.gmra.mrb[122].mxu1 %v1368_v61 }
 0x393   : > { %1567 = vmatprep.mubr.f32.mxu1 %v4309_v35 }
 0x394   : > { %v1369_v1 = vmax.f32 %v1267_v19, 0.0 }
 0x395   : > { %v1271_v8 = vpop.f32.mrb[62].mxu0 }
 0x396   : > { %v1272_v41 = vadd.f32 %v1271_v8, %v3267_v26  ;;  %v1273_v23 = vpop.f32.mrb[63].mxu0  ;;  %1568 = vmatmul.mubr.f32.gmra.mrb[124].mxu1 %v1369_v1 }
 0x397   : > { %1573 = vmatprep.mubr.f32.mxu1 %v4309_v35 }
 0x398   : > { %v1370_v6 = vmax.f32 %v1272_v41, 0.0 }
 0x399   : > { %v1276_v20 = vpop.f32.mrb[64].mxu0 }
 0x39a   : > { %v1277_v47 = vadd.f32 %v1276_v20, %v3270_v32  ;;  %v1278_v46 = vpop.f32.mrb[65].mxu0  ;;  %1574 = vmatmul.mubr.f32.gmra.mrb[126].mxu1 %v1370_v6 }
 0x39b   : > { %1579 = vmatprep.mubr.f32.mxu1 %v4309_v35 }
 0x39c   : > { %v1371_v7 = vmax.f32 %v1277_v47, 0.0 }
 0x39d   : > { %v1281_v27 = vpop.f32.mrb[66].mxu0 }
 0x39e   : > { %v1282_v0 = vadd.f32 %v1281_v27, %v3272_v30  ;;  %v1283_v54 = vpop.f32.mrb[67].mxu0  ;;  %1580 = vmatmul.mubr.f32.gmra.mrb[128].mxu1 %v1371_v7 }
 0x39f   : > { %1585 = vmatprep.mubr.f32.mxu1 %v4309_v35 }
 0x3a0   : > { %v1372_v26 = vmax.f32 %v1282_v0, 0.0 }
 0x3a1   : > { %v1286_v49 = vpop.f32.mrb[68].mxu0 }
 0x3a2   : > { %v1287_v10 = vadd.f32 %v1286_v49, %v3275_v44  ;;  %v1288_v31 = vpop.f32.mrb[69].mxu0  ;;  %1586 = vmatmul.mubr.f32.gmra.mrb[130].mxu1 %v1372_v26 }
 0x3a3   : > { %1591 = vmatprep.mubr.f32.mxu1 %v4309_v35 }
 0x3a4   : > { %v1373_v32 = vmax.f32 %v1287_v10, 0.0 }
 0x3a5   : > { %v1291_v11 = vpop.f32.mrb[70].mxu0 }
 0x3a6   : > { %v1292_v53 = vadd.f32 %v1291_v11, %v3277_v48  ;;  %v1293_v33 = vpop.f32.mrb[71].mxu0  ;;  %1592 = vmatmul.mubr.f32.gmra.mrb[132].mxu1 %v1373_v32 }
 0x3a7   : > { %1597 = vmatprep.mubr.f32.mxu1 %v4309_v35 }
 0x3a8   : > { %v1374_v30 = vmax.f32 %v1292_v53, 0.0 }
 0x3a9   : > { %v1296_v15 = vpop.f32.mrb[72].mxu0 }
 0x3aa   : > { %v1297_v34 = vadd.f32 %v1296_v15, %v3280_v62  ;;  %v1298_v57 = vpop.f32.mrb[73].mxu0  ;;  %1598 = vmatmul.mubr.f32.gmra.mrb[134].mxu1 %v1374_v30 }
 0x3ab   : > { %1603 = vmatprep.mubr.f32.mxu1 %v4309_v35 }
 0x3ac   : > { %v1375_v44 = vmax.f32 %v1297_v34, 0.0 }
 0x3ad   : > { %v1301_v52 = vpop.f32.mrb[74].mxu0 }
 0x3ae   : > { %v1302_v58 = vadd.f32 %v1301_v52, %v3282_v60  ;;  %v1303_v16 = vpop.f32.mrb[75].mxu0  ;;  %1604 = vmatmul.mubr.f32.gmra.mrb[136].mxu1 %v1375_v44 }
 0x3af   : > { %1609 = vmatprep.mubr.f32.mxu1 %v4309_v35 }
 0x3b0   : > { %v1376_v48 = vmax.f32 %v1302_v58, 0.0 }
 0x3b1   : > { %v1306_v61 = vpop.f32.mrb[76].mxu0 }
 0x3b2   : > { %v1307_v39 = vadd.f32 %v1306_v61, %v3285_v3  ;;  %v1308_v19 = vpop.f32.mrb[77].mxu0  ;;  %1610 = vmatmul.mubr.f32.gmra.mrb[138].mxu1 %v1376_v48 }
 0x3b3   : > { %1615 = vmatprep.mubr.f32.mxu1 %v4309_v35  ;;  %v4310_v19 = vmov 0.0|0.0  }
 0x3b4   : > { %v1377_v62 = vmax.f32 %v1307_v39, 0.0 }
 0x3b5   : > { %v1311_v22 = vpop.f32.mrb[78].mxu0 }
 0x3b6   : > { %v1312_v1 = vadd.f32 %v1311_v22, %v3287_v13  ;;  %v1313_v8 = vpop.f32.mrb[79].mxu0  ;;  %1616 = vmatmul.mubr.f32.gmra.mrb[140].mxu1 %v1377_v62 }
 0x3b7   : > { %1621 = vmatprep.mubr.f32.mxu1 %v4309_v35 }
 0x3b8   : > { %v1378_v60 = vmax.f32 %v1312_v1, 0.0 }
 0x3b9   : > { %v1316_v41 = vpop.f32.mrb[80].mxu0 }
 0x3ba   : > { %v1317_v23 = vadd.f32 %v1316_v41, %v3290_v17  ;;  %v1318_v6 = vpop.f32.mrb[81].mxu0  ;;  %1622 = vmatmul.mubr.f32.gmra.mrb[142].mxu1 %v1378_v60 }
 0x3bb   : > { %1627 = vmatprep.mubr.f32.mxu1 %v4309_v35 }
 0x3bc   : > { %v1379_v3 = vmax.f32 %v1317_v23, 0.0 }
 0x3bd   : > { %v1321_v20 = vpop.f32.mrb[82].mxu0 }
 0x3be   : > { %v1322_v47 = vadd.f32 %v1321_v20, %v3292_v25  ;;  %v1323_v46 = vpop.f32.mrb[83].mxu0  ;;  %1628 = vmatmul.mubr.f32.gmra.mrb[144].mxu1 %v1379_v3 }
 0x3bf   : > { %1633 = vmatprep.mubr.f32.mxu1 %v4309_v35 }
 0x3c0   : > { %v1380_v13 = vmax.f32 %v1322_v47, 0.0 }
 0x3c1   : > { %v1326_v7 = vpop.f32.mrb[84].mxu0 }
 0x3c2   : > { %v1327_v27 = vadd.f32 %v1326_v7, %v3295_v29  ;;  %v1328_v0 = vpop.f32.mrb[85].mxu0  ;;  %1634 = vmatmul.mubr.f32.gmra.mrb[146].mxu1 %v1380_v13 }
 0x3c3   : > { %1639 = vmatprep.mubr.f32.mxu1 %v4309_v35 }
 0x3c4   : > { %v1381_v17 = vmax.f32 %v1327_v27, 0.0 }
 0x3c5   : > { %v1331_v54 = vpop.f32.mrb[86].mxu0 }
 0x3c6   : > { %v1332_v26 = vadd.f32 %v1331_v54, %v3297_v37  ;;  %v1333_v49 = vpop.f32.mrb[87].mxu0  ;;  %1640 = vmatmul.mubr.f32.gmra.mrb[148].mxu1 %v1381_v17 }
 0x3c7   : > { %1645 = vmatprep.mubr.f32.mxu1 %v4309_v35 }
 0x3c8   : > { %v1382_v25 = vmax.f32 %v1332_v26, 0.0 }
 0x3c9   : > { %v1336_v10 = vpop.f32.mrb[88].mxu0 }
 0x3ca   : > { %v1337_v31 = vadd.f32 %v1336_v10, %v3300_v43  ;;  %v1338_v32 = vpop.f32.mrb[89].mxu0  ;;  %1646 = vmatmul.mubr.f32.gmra.mrb[150].mxu1 %v1382_v25 }
 0x3cb   : > { %1651 = vmatprep.mubr.f32.mxu1 %v4309_v35 }
 0x3cc   : > { %v1383_v29 = vmax.f32 %v1337_v31, 0.0 }
 0x3cd   : > { %v1341_v11 = vpop.f32.mrb[90].mxu0 }
 0x3ce   : > { %v1342_v53 = vadd.f32 %v1341_v11, %v3302_v51  ;;  %v1343_v33 = vpop.f32.mrb[91].mxu0  ;;  %1652 = vmatmul.mubr.f32.gmra.mrb[152].mxu1 %v1383_v29 }
 0x3cf   : > { %1657 = vmatprep.mubr.f32.mxu1 %v4309_v35 }
 0x3d0   : > { %v1384_v37 = vmax.f32 %v1342_v53, 0.0 }
 0x3d1   : > { %v1346_v30 = vpop.f32.mrb[92].mxu0 }
 0x3d2   : > { %v1347_v15 = vadd.f32 %v1346_v30, %v3305_v55  ;;  %v1348_v34 = vpop.f32.mrb[93].mxu0  ;;  %1658 = vmatmul.mubr.f32.gmra.mrb[154].mxu1 %v1384_v37 }
 0x3d3   : > { %1663 = vmatprep.mubr.f32.mxu1 %v4309_v35 }
 0x3d4   : > { %v1385_v43 = vmax.f32 %v1347_v15, 0.0 }
 0x3d5   : > { %v1351_v57 = vpop.f32.mrb[94].mxu0 }
 0x3d6   : > { %v1352_v44 = vadd.f32 %v1351_v57, %v3307_v63  ;;  %v1353_v52 = vpop.f32.mrb[95].mxu0  ;;  %1664 = vmatmul.mubr.f32.gmra.mrb[156].mxu1 %v1385_v43 }
 0x3d7   : > { %1669 = vmatprep.mubr.f32.mxu1 %v4309_v35 }
 0x3d8   : > { %v1386_v51 = vmax.f32 %v1352_v44, 0.0 }
 0x3da   : > { %1670 = vmatmul.mubr.f32.gmra.mrb[158].mxu1 %v1386_v51 }
 0x431   : > { %v1485_v58 = vpop.f32.mrb[96].mxu1 }
 0x432   : > { %v3752_v16 = vpop.f32.mrb[97].mxu1 }
 0x435   : > { %v1491_v48 = vpop.f32.mrb[98].mxu1 }
 0x436   : > { %v2435_v61 = vpack.c.bf16 %v1491_v48, %v1485_v58  ;;  %v3754_v55 = vpop.f32.mrb[99].mxu1 }
 0x438   : > { %2436 = vmatpush1.bf16.msra.mxu0 %v2435_v61 }
 0x439   : > { %v1497_v39 = vpop.f32.mrb[100].mxu1  ;;  %2437 = vmatprep.subr.bf16.mxu0 %v4310_v19 }
 0x43a   : > { %v3757_v62 = vpop.f32.mrb[101].mxu1 }
 0x43d   : > { %v1503_v63 = vpop.f32.mrb[102].mxu1 }
 0x43e   : > { %v2438_v22 = vpack.c.bf16 %v1503_v63, %v1497_v39  ;;  %v3759_v1 = vpop.f32.mrb[103].mxu1 }
 0x440   : > { %2439 = vmatpush1.bf16.msra.mxu0 %v2438_v22 }
 0x441   : > { %v1509_v35 = vpop.f32.mrb[104].mxu1  ;;  %2440 = vmatprep.subr.bf16.mxu0 %v4310_v19 }
 0x442   : > { %v3762_v8 = vpop.f32.mrb[105].mxu1 }
 0x445   : > { %v1515_v60 = vpop.f32.mrb[106].mxu1 }
 0x446   : > { %v2441_v41 = vpack.c.bf16 %v1515_v60, %v1509_v35  ;;  %v3764_v23 = vpop.f32.mrb[107].mxu1 }
 0x448   : > { %2442 = vmatpush1.bf16.msra.mxu0 %v2441_v41 }
 0x449   : > { %v1521_v6 = vpop.f32.mrb[108].mxu1  ;;  %2443 = vmatprep.subr.bf16.mxu0 %v4310_v19 }
 0x44a   : > { %v3767_v3 = vpop.f32.mrb[109].mxu1 }
 0x44d   : > { %v1527_v20 = vpop.f32.mrb[110].mxu1 }
 0x44e   : > { %v2444_v47 = vpack.c.bf16 %v1527_v20, %v1521_v6  ;;  %v3769_v46 = vpop.f32.mrb[111].mxu1 }
 0x450   : > { %2445 = vmatpush1.bf16.msra.mxu0 %v2444_v47 }
 0x451   : > { %v1533_v13 = vpop.f32.mrb[112].mxu1  ;;  %2446 = vmatprep.subr.bf16.mxu0 %v4310_v19 }
 0x452   : > { %v3772_v7 = vpop.f32.mrb[113].mxu1 }
 0x455   : > { %v1539_v27 = vpop.f32.mrb[114].mxu1 }
 0x456   : > { %v2447_v0 = vpack.c.bf16 %v1539_v27, %v1533_v13  ;;  %v3774_v17 = vpop.f32.mrb[115].mxu1 }
 0x458   : > { %2448 = vmatpush1.bf16.msra.mxu0 %v2447_v0 }
 0x459   : > { %v1545_v54 = vpop.f32.mrb[116].mxu1  ;;  %2449 = vmatprep.subr.bf16.mxu0 %v4310_v19 }
 0x45a   : > { %v3777_v26 = vpop.f32.mrb[117].mxu1 }
 0x45d   : > { %v1551_v49 = vpop.f32.mrb[118].mxu1 }
 0x45e   : > { %v2450_v25 = vpack.c.bf16 %v1551_v49, %v1545_v54  ;;  %v3779_v10 = vpop.f32.mrb[119].mxu1 }
 0x460   : > { %2451 = vmatpush1.bf16.msra.mxu0 %v2450_v25 }
 0x461   : > { %v1557_v31 = vpop.f32.mrb[120].mxu1  ;;  %2452 = vmatprep.subr.bf16.mxu0 %v4310_v19 }
 0x462   : > { %v3782_v32 = vpop.f32.mrb[121].mxu1 }
 0x465   : > { %v1563_v29 = vpop.f32.mrb[122].mxu1 }
 0x466   : > { %v2453_v11 = vpack.c.bf16 %v1563_v29, %v1557_v31  ;;  %v3784_v53 = vpop.f32.mrb[123].mxu1 }
 0x468   : > { %2454 = vmatpush1.bf16.msra.mxu0 %v2453_v11 }
 0x469   : > { %v1569_v33 = vpop.f32.mrb[124].mxu1  ;;  %2455 = vmatprep.subr.bf16.mxu0 %v4310_v19 }
 0x46a   : > { %v3787_v37 = vpop.f32.mrb[125].mxu1 }
 0x46d   : > { %v1575_v30 = vpop.f32.mrb[126].mxu1 }
 0x46e   : > { %v2456_v15 = vpack.c.bf16 %v1575_v30, %v1569_v33  ;;  %v3789_v34 = vpop.f32.mrb[127].mxu1 }
 0x470   : > { %2457 = vmatpush1.bf16.msra.mxu0 %v2456_v15 }
 0x471   : > { %v1581_v43 = vpop.f32.mrb[128].mxu1  ;;  %2458 = vmatprep.subr.bf16.mxu0 %v4310_v19 }
 0x472   : > { %v3792_v57 = vpop.f32.mrb[129].mxu1 }
 0x475   : > { %v1587_v44 = vpop.f32.mrb[130].mxu1 }
 0x476   : > { %v2459_v52 = vpack.c.bf16 %v1587_v44, %v1581_v43  ;;  %v3794_v51 = vpop.f32.mrb[131].mxu1 }
 0x478   : > { %2460 = vmatpush1.bf16.msra.mxu0 %v2459_v52 }
 0x479   : > { %v1593_v58 = vpop.f32.mrb[132].mxu1  ;;  %2461 = vmatprep.subr.bf16.mxu0 %v4310_v19 }
 0x47a   : > { %v3797_v48 = vpop.f32.mrb[133].mxu1 }
 0x47d   : > { %v1599_v61 = vpop.f32.mrb[134].mxu1 }
 0x47e   : > { %v2462_v39 = vpack.c.bf16 %v1599_v61, %v1593_v58  ;;  %v3799_v63 = vpop.f32.mrb[135].mxu1 }
 0x480   : > { %2463 = vmatpush1.bf16.msra.mxu0 %v2462_v39 }
 0x481   : > { %v1605_v22 = vpop.f32.mrb[136].mxu1  ;;  %2464 = vmatprep.subr.bf16.mxu0 %v4310_v19 }
 0x482   : > { %v3802_v35 = vpop.f32.mrb[137].mxu1 }
 0x485   : > { %v1611_v60 = vpop.f32.mrb[138].mxu1 }
 0x486   : > { %v2465_v41 = vpack.c.bf16 %v1611_v60, %v1605_v22  ;;  %v3804_v6 = vpop.f32.mrb[139].mxu1 }
 0x488   : > { %2466 = vmatpush1.bf16.msra.mxu0 %v2465_v41 }
 0x489   : > { %v1617_v20 = vpop.f32.mrb[140].mxu1  ;;  %2467 = vmatprep.subr.bf16.mxu0 %v4310_v19 }
 0x48a   : > { %v3807_v47 = vpop.f32.mrb[141].mxu1 }
 0x48d   : > { %v1623_v13 = vpop.f32.mrb[142].mxu1 }
 0x48e   : > { %v2468_v27 = vpack.c.bf16 %v1623_v13, %v1617_v20  ;;  %v3809_v0 = vpop.f32.mrb[143].mxu1 }
 0x490   : > { %2469 = vmatpush1.bf16.msra.mxu0 %v2468_v27  ;;  %v4330_v27 = vld [vmem:[#allocation30_spill] sm:$0xff] }
 0x491   : > { %v1629_v54 = vpop.f32.mrb[144].mxu1  ;;  %2470 = vmatprep.subr.bf16.mxu0 %v4310_v19 }
 0x492   : > { %v3812_v49 = vpop.f32.mrb[145].mxu1 }
 0x495   : > { %v1635_v25 = vpop.f32.mrb[146].mxu1 }
 0x496   : > { %v2471_v31 = vpack.c.bf16 %v1635_v25, %v1629_v54  ;;  %v3814_v29 = vpop.f32.mrb[147].mxu1  ;;  %v4331_v54 = vld [vmem:[#allocation31_spill] sm:$0xff]  ;;  %v4332_v25 = vld [vmem:[#allocation32_spill] sm:$0xff] }
 0x498   : > { %2472 = vmatpush1.bf16.msra.mxu0 %v2471_v31  ;;  %v4333_v31 = vld [vmem:[#allocation33_spill] sm:$0xff] }
 0x499   : > { %v1641_v11 = vpop.f32.mrb[148].mxu1  ;;  %2473 = vmatprep.subr.bf16.mxu0 %v4310_v19 }
 0x49a   : > { %v3817_v33 = vpop.f32.mrb[149].mxu1 }
 0x49d   : > { %v1647_v30 = vpop.f32.mrb[150].mxu1 }
 0x49e   : > { %v2474_v15 = vpack.c.bf16 %v1647_v30, %v1641_v11  ;;  %v3819_v43 = vpop.f32.mrb[151].mxu1  ;;  %v4334_v11 = vld [vmem:[#allocation34_spill] sm:$0xff]  ;;  %v4335_v30 = vld [vmem:[#allocation35_spill] sm:$0xff] }
 0x4a0   : > { %2475 = vmatpush1.bf16.msra.mxu0 %v2474_v15  ;;  %v4336_v15 = vld [vmem:[#allocation36_spill] sm:$0xff] }
 0x4a1   : > { %v1653_v44 = vpop.f32.mrb[152].mxu1  ;;  %2476 = vmatprep.subr.bf16.mxu0 %v4310_v19 }
 0x4a2   : > { %v3822_v52 = vpop.f32.mrb[153].mxu1 }
 0x4a5   : > { %v1659_v58 = vpop.f32.mrb[154].mxu1 }
 0x4a6   : > { %v2477_v61 = vpack.c.bf16 %v1659_v58, %v1653_v44  ;;  %v3824_v39 = vpop.f32.mrb[155].mxu1  ;;  %v4337_v44 = vld [vmem:[#allocation37_spill] sm:$0xff]  ;;  %v4338_v58 = vld [vmem:[#allocation38_spill] sm:$0xff] }
 0x4a8   : > { %2478 = vmatpush1.bf16.msra.mxu0 %v2477_v61  ;;  %v4339_v61 = vld [vmem:[#allocation39_spill] sm:$0xff] }
 0x4a9   : > { %v1665_v22 = vpop.f32.mrb[156].mxu1  ;;  %2479 = vmatprep.subr.bf16.mxu0 %v4310_v19  ;;  %v4329_v19 = vld [vmem:[#allocation29_spill] sm:$0xff] }
 0x4aa   : > { %v3827_v60 = vpop.f32.mrb[157].mxu1 }
 0x4ad   : > { %v1671_v41 = vpop.f32.mrb[158].mxu1 }
 0x4ae   : > { %v2480_v20 = vpack.c.bf16 %v1671_v41, %v1665_v22  ;;  %v3829_v13 = vpop.f32.mrb[159].mxu1  ;;  %v4340_v22 = vld [vmem:[#allocation40_spill] sm:$0xff]  ;;  %v4341_v41 = vld [vmem:[#allocation41_spill] sm:$0xff] }
 0x4b0   : > { %2481 = vmatpush1.bf16.msra.mxu0 %v2480_v20  ;;  %v4342_v20 = vld [vmem:[#allocation42_spill] sm:$0xff] }
 0x4b3   : > { %1741 = vmatmul.mubr.f32.vlgmr.msra.gmra.mrb[96].mxu0 %v3312_v2  ;;  %v4311_v2 = vld [vmem:[#allocation11_spill] sm:$0xff] }
 0x4b4   : > { %1745 = vmatprep.mubr.f32.mxu0 %v3317_v4  ;;  %v4312_v4 = vld [vmem:[#allocation12_spill] sm:$0xff] }
 0x4b7   : > { %1746 = vmatmul.mubr.f32.gmra.mrb[98].mxu0 %v3325_v9  ;;  %v4313_v9 = vld [vmem:[#allocation13_spill] sm:$0xff] }
 0x4b8   : > { %1750 = vmatprep.mubr.f32.mxu0 %v3330_v28  ;;  %v4314_v28 = vld [vmem:[#allocation14_spill] sm:$0xff] }
 0x4bb   : > { %1751 = vmatmul.mubr.f32.gmra.mrb[100].mxu0 %v3337_v45  ;;  %v4315_v45 = vld [vmem:[#allocation15_spill] sm:$0xff] }
 0x4bc   : > { %1755 = vmatprep.mubr.f32.mxu0 %v3342_v59  ;;  %v4316_v59 = vld [vmem:[#allocation16_spill] sm:$0xff] }
 0x4bf   : > { %1756 = vmatmul.mubr.f32.gmra.mrb[102].mxu0 %v3349_v18  ;;  %v4317_v18 = vld [vmem:[#allocation17_spill] sm:$0xff] }
 0x4c0   : > { %1760 = vmatprep.mubr.f32.mxu0 %v3354_v42  ;;  %v4318_v42 = vld [vmem:[#allocation18_spill] sm:$0xff] }
 0x4c3   : > { %1761 = vmatmul.mubr.f32.gmra.mrb[104].mxu0 %v3361_v5  ;;  %v4319_v5 = vld [vmem:[#allocation19_spill] sm:$0xff] }
 0x4c4   : > { %1765 = vmatprep.mubr.f32.mxu0 %v3366_v21  ;;  %v4320_v21 = vld [vmem:[#allocation20_spill] sm:$0xff] }
 0x4c7   : > { %1766 = vmatmul.mubr.f32.gmra.mrb[106].mxu0 %v3373_v40  ;;  %v4321_v40 = vld [vmem:[#allocation21_spill] sm:$0xff] }
 0x4c8   : > { %1770 = vmatprep.mubr.f32.mxu0 %v3378_v14  ;;  %v4322_v14 = vld [vmem:[#allocation22_spill] sm:$0xff] }
 0x4cb   : > { %1771 = vmatmul.mubr.f32.gmra.mrb[108].mxu0 %v3385_v12  ;;  %v4323_v12 = vld [vmem:[#allocation23_spill] sm:$0xff] }
 0x4cc   : > { %1775 = vmatprep.mubr.f32.mxu0 %v3390_v24  ;;  %v4324_v24 = vld [vmem:[#allocation24_spill] sm:$0xff] }
 0x4cf   : > { %1776 = vmatmul.mubr.f32.gmra.mrb[110].mxu0 %v3397_v38  ;;  %v4325_v38 = vld [vmem:[#allocation25_spill] sm:$0xff] }
 0x4d0   : > { %1780 = vmatprep.mubr.f32.mxu0 %v3402_v36  ;;  %v4326_v36 = vld [vmem:[#allocation26_spill] sm:$0xff] }
 0x4d3   : > { %1781 = vmatmul.mubr.f32.gmra.mrb[112].mxu0 %v3409_v50  ;;  %v4327_v50 = vld [vmem:[#allocation27_spill] sm:$0xff] }
 0x4d4   : > { %1785 = vmatprep.mubr.f32.mxu0 %v3414_v56  ;;  %v4328_v56 = vld [vmem:[#allocation28_spill] sm:$0xff] }
 0x4d7   : > { %1786 = vmatmul.mubr.f32.gmra.mrb[114].mxu0 %v4311_v2  ;;  %v4343_v2 = vld [vmem:[#allocation43_spill] sm:$0xff] }
 0x4d8   : > { %1790 = vmatprep.mubr.f32.mxu0 %v4312_v4  ;;  %v4344_v4 = vld [vmem:[#allocation44_spill] sm:$0xff] }
 0x4db   : > { %1791 = vmatmul.mubr.f32.gmra.mrb[116].mxu0 %v4313_v9  ;;  %v4345_v9 = vld [vmem:[#allocation45_spill] sm:$0xff] }
 0x4dc   : > { %1795 = vmatprep.mubr.f32.mxu0 %v4314_v28  ;;  %v4346_v28 = vld [vmem:[#allocation46_spill] sm:$0xff] }
 0x4df   : > { %1796 = vmatmul.mubr.f32.gmra.mrb[118].mxu0 %v4315_v45  ;;  %v4347_v45 = vld [vmem:[#allocation47_spill] sm:$0xff] }
 0x4e0   : > { %1800 = vmatprep.mubr.f32.mxu0 %v4316_v59  ;;  %v4348_v59 = vld [vmem:[#allocation48_spill] sm:$0xff] }
 0x4e3   : > { %1801 = vmatmul.mubr.f32.gmra.mrb[120].mxu0 %v4317_v18  ;;  %v4349_v18 = vld [vmem:[#allocation49_spill] sm:$0xff] }
 0x4e4   : > { %1805 = vmatprep.mubr.f32.mxu0 %v4318_v42  ;;  %v4350_v42 = vld [vmem:[#allocation50_spill] sm:$0xff] }
 0x4e7   : > { %1806 = vmatmul.mubr.f32.gmra.mrb[122].mxu0 %v4319_v5  ;;  %v4351_v5 = vld [vmem:[#allocation51_spill] sm:$0xff] }
 0x4e8   : > { %1810 = vmatprep.mubr.f32.mxu0 %v4320_v21  ;;  %v4352_v21 = vld [vmem:[#allocation52_spill] sm:$0xff] }
 0x4eb   : > { %1811 = vmatmul.mubr.f32.gmra.mrb[124].mxu0 %v4321_v40  ;;  %v4353_v40 = vld [vmem:[#allocation53_spill] sm:$0xff] }
 0x4ec   : > { %1815 = vmatprep.mubr.f32.mxu0 %v4322_v14  ;;  %v4354_v14 = vld [vmem:[#allocation54_spill] sm:$0xff] }
 0x4ef   : > { %1816 = vmatmul.mubr.f32.gmra.mrb[126].mxu0 %v4323_v12  ;;  %v4355_v12 = vld [vmem:[#allocation55_spill] sm:$0xff] }
 0x4f0   : > { %1820 = vmatprep.mubr.f32.mxu0 %v4324_v24 }
 0x4f3   : > { %1821 = vmatmul.mubr.f32.gmra.mrb[128].mxu0 %v4325_v38 }
 0x4f4   : > { %1825 = vmatprep.mubr.f32.mxu0 %v4326_v36 }
 0x4f7   : > { %1826 = vmatmul.mubr.f32.gmra.mrb[130].mxu0 %v4327_v50 }
 0x4f8   : > { %1830 = vmatprep.mubr.f32.mxu0 %v4328_v56  ;;  %v3898_v56 = vld [vmem:[%s4201_s5] sm:$0x3] }
 0x4f9   : > { %2284 = vmatprep.mubr.f32.mxu1 %v3898_v56 }
 0x4fb   : > { %1831 = vmatmul.mubr.f32.gmra.mrb[132].mxu0 %v4329_v19 }
 0x4fc   : > { %1835 = vmatprep.mubr.f32.mxu0 %v4330_v27 }
 0x4ff   : > { %1836 = vmatmul.mubr.f32.gmra.mrb[134].mxu0 %v4331_v54 }
 0x500   : > { %1840 = vmatprep.mubr.f32.mxu0 %v4332_v25 }
 0x503   : > { %1841 = vmatmul.mubr.f32.gmra.mrb[136].mxu0 %v4333_v31 }
 0x504   : > { %1845 = vmatprep.mubr.f32.mxu0 %v4334_v11 }
 0x507   : > { %1846 = vmatmul.mubr.f32.gmra.mrb[138].mxu0 %v4335_v30 }
 0x508   : > { %1850 = vmatprep.mubr.f32.mxu0 %v4336_v15  ;;  %v2647_v15 = vld [vmem:[%s4197_s1] sm:$0xff] }
 0x50b   : > { %1851 = vmatmul.mubr.f32.gmra.mrb[140].mxu0 %v4337_v44  ;;  %v2648_v44 = vld [vmem:[%s4197_s1 + $0x10] sm:$0xff] }
 0x50c   : > { %1855 = vmatprep.mubr.f32.mxu0 %v4338_v58  ;;  %v2649_v58 = vld [vmem:[%s4197_s1 + $0x8] sm:$0xff] }
 0x50f   : > { %1856 = vmatmul.mubr.f32.gmra.mrb[142].mxu0 %v4339_v61  ;;  %v2650_v61 = vld [vmem:[%s4197_s1 + $0x18] sm:$0xff] }
 0x510   : > { %1860 = vmatprep.mubr.f32.mxu0 %v4340_v22  ;;  %v2514_v22 = vpack.c.bf16 %v2650_v61, %v2649_v58 }
 0x512   : > { %2515 = vmatprep.subr.bf16.mxu0 %v2514_v22 }
 0x513   : > { %1861 = vmatmul.mubr.f32.gmra.mrb[144].mxu0 %v4341_v41  ;;  %v2652_v41 = vld [vmem:[%s4197_s1 + $0x38] sm:$0xff] }
 0x514   : > { %1865 = vmatprep.mubr.f32.mxu0 %v4342_v20 }
 0x517   : > { %1866 = vmatmul.mubr.f32.gmra.mrb[146].mxu0 %v4343_v2 }
 0x518   : > { %1870 = vmatprep.mubr.f32.mxu0 %v4344_v4 }
 0x51b   : > { %1871 = vmatmul.mubr.f32.gmra.mrb[148].mxu0 %v4345_v9 }
 0x51c   : > { %1875 = vmatprep.mubr.f32.mxu0 %v4346_v28 }
 0x51f   : > { %1876 = vmatmul.mubr.f32.gmra.mrb[150].mxu0 %v4347_v45 }
 0x520   : > { %1880 = vmatprep.mubr.f32.mxu0 %v4348_v59 }
 0x523   : > { %1881 = vmatmul.mubr.f32.gmra.mrb[152].mxu0 %v4349_v18 }
 0x524   : > { %1885 = vmatprep.mubr.f32.mxu0 %v4350_v42 }
 0x527   : > { %1886 = vmatmul.mubr.f32.gmra.mrb[154].mxu0 %v4351_v5 }
 0x528   : > { %1890 = vmatprep.mubr.f32.mxu0 %v4352_v21  ;;  %v2653_v21 = vld [vmem:[%s4197_s1 + $0x20] sm:$0xff] }
 0x52b   : > { %1891 = vmatmul.mubr.f32.gmra.mrb[156].mxu0 %v4353_v40 }
 0x52c   : > { %1895 = vmatprep.mubr.f32.mxu0 %v4354_v14  ;;  %v2655_v14 = vld [vmem:[%s4197_s1 + $0x48] sm:$0xff] }
 0x52f   : > { %1896 = vmatmul.mubr.f32.gmra.mrb[158].mxu0 %v4355_v12  ;;  %v2656_v12 = vld [vmem:[%s4197_s1 + $0x58] sm:$0xff] }
 0x586   : > { %v1742_v24 = vpop.f32.mrb[96].mxu0 }
 0x587   : > { %v1743_v38 = vadd.f32 %v1742_v24, %v3752_v16  ;;  %v1744_v36 = vpop.f32.mrb[97].mxu0  ;;  %v2522_v24 = vpack.c.bf16 %v2656_v12, %v2655_v14 }
 0x589   : > { %v1901_v54 = vmax.f32 %v1743_v38, 0.0 }
 0x58a   : > { %v1747_v50 = vpop.f32.mrb[98].mxu0 }
 0x58b   : > { %v1748_v19 = vadd.f32 %v1747_v50, %v3754_v55  ;;  %v1749_v27 = vpop.f32.mrb[99].mxu0  ;;  %v2516_v55 = vpack.c.bf16 %v2648_v44, %v2647_v15  ;;  %v2659_v15 = vld [vmem:[%s4197_s1 + $0x68] sm:$0xff]  ;;  %v2660_v44 = vld [vmem:[%s4197_s1 + $0x78] sm:$0xff] }
 0x58d   : > { %v1902_v25 = vmax.f32 %v1748_v19, 0.0  ;;  %2517 = vmatpush1.bf16.xpose.msra.mxu0 %v2516_v55  ;;  %v2526_v55 = vpack.c.bf16 %v2660_v44, %v2659_v15 }
 0x58e   : > { %v1752_v31 = vpop.f32.mrb[100].mxu0 }
 0x58f   : > { %v3902_v11 = vpack.c.bf16 %v1902_v25, %v1901_v54  ;;  %v1753_v30 = vadd.f32 %v1752_v31, %v3757_v62  ;;  %v1754_v16 = vpop.f32.mrb[101].mxu0  ;;  %v2651_v62 = vld [vmem:[%s4197_s1 + $0x28] sm:$0xff] }
 0x590   : > { %v2518_v20 = vpack.c.bf16 %v2652_v41, %v2651_v62  ;;  %v2658_v16 = vld [vmem:[%s4197_s1 + $0x50] sm:$0xff] }
 0x591   : > { %v1903_v28 = vmax.f32 %v1753_v30, 0.0  ;;  %v2657_v30 = vld [vmem:[%s4197_s1 + $0x40] sm:$0xff] }
 0x592   : > { %v1757_v2 = vpop.f32.mrb[102].mxu0  ;;  %2519 = vmatprep.subr.bf16.mxu0 %v2518_v20 }
 0x593   : > { %v1758_v4 = vadd.f32 %v1757_v2, %v3759_v1  ;;  %v1759_v9 = vpop.f32.mrb[103].mxu0  ;;  %v2654_v1 = vld [vmem:[%s4197_s1 + $0x30] sm:$0xff] }
 0x594   : > { %v2520_v40 = vpack.c.bf16 %v2654_v1, %v2653_v21  ;;  %v2661_v9 = vld [vmem:[%s4197_s1 + $0x60] sm:$0xff] }
 0x595   : > { %v1904_v45 = vmax.f32 %v1758_v4, 0.0 }
 0x596   : > { %v1762_v59 = vpop.f32.mrb[104].mxu0  ;;  %2521 = vmatpush1.bf16.xpose.msra.mxu0 %v2520_v40 }
 0x597   : > { %v3924_v18 = vpack.c.bf16 %v1904_v45, %v1903_v28  ;;  %v1763_v42 = vadd.f32 %v1762_v59, %v3762_v8  ;;  %v1764_v5 = vpop.f32.mrb[105].mxu0  ;;  %2523 = vmatprep.subr.bf16.mxu0 %v2522_v24  ;;  %v2662_v28 = vld [vmem:[%s4197_s1 + $0x70] sm:$0xff]  ;;  %v2663_v45 = vld [vmem:[%s4197_s1 + $0x88] sm:$0xff]  ;;  %v2664_v59 = vld [vmem:[%s4197_s1 + $0x98] sm:$0xff] }
 0x599   : > { %v1905_v50 = vmax.f32 %v1763_v42, 0.0  ;;  %v2530_v42 = vpack.c.bf16 %v2664_v59, %v2663_v45 }
 0x59a   : > { %v1767_v8 = vpop.f32.mrb[106].mxu0 }
 0x59b   : > { %v1768_v38 = vadd.f32 %v1767_v8, %v3764_v23  ;;  %v1769_v36 = vpop.f32.mrb[107].mxu0  ;;  %v2524_v23 = vpack.c.bf16 %v2658_v16, %v2657_v30 }
 0x59c   : > { %v2666_v36 = vld [vmem:[%s4197_s1 + $0x90] sm:$0xff] }
 0x59d   : > { %v1906_v19 = vmax.f32 %v1768_v38, 0.0  ;;  %v2665_v38 = vld [vmem:[%s4197_s1 + $0x80] sm:$0xff] }
 0x59e   : > { %v1772_v27 = vpop.f32.mrb[108].mxu0  ;;  %2525 = vmatpush1.bf16.xpose.msra.mxu0 %v2524_v23 }
 0x59f   : > { %v3940_v54 = vpack.c.bf16 %v1906_v19, %v1905_v50  ;;  %v1773_v25 = vadd.f32 %v1772_v27, %v3767_v3  ;;  %v1774_v31 = vpop.f32.mrb[109].mxu0  ;;  %2527 = vmatprep.subr.bf16.mxu0 %v2526_v55  ;;  %v2667_v50 = vld [vmem:[%s4197_s1 + $0xa8] sm:$0xff]  ;;  %v2668_v19 = vld [vmem:[%s4197_s1 + $0xb8] sm:$0xff] }
 0x5a0   : > { %v2534_v27 = vpack.c.bf16 %v2668_v19, %v2667_v50  ;;  %v2677_v19 = vld [vmem:[%s4197_s1 + $0xe0] sm:$0xff] }
 0x5a1   : > { %v1907_v22 = vmax.f32 %v1773_v25, 0.0 }
 0x5a2   : > { %v1777_v3 = vpop.f32.mrb[110].mxu0 }
 0x5a3   : > { %v1778_v58 = vadd.f32 %v1777_v3, %v3769_v46  ;;  %v1779_v61 = vpop.f32.mrb[111].mxu0  ;;  %v2528_v46 = vpack.c.bf16 %v2662_v28, %v2661_v9  ;;  %v2669_v3 = vld [vmem:[%s4197_s1 + $0xa0] sm:$0xff] }
 0x5a4   : > { %v2671_v61 = vld [vmem:[%s4197_s1 + $0xc8] sm:$0xff] }
 0x5a5   : > { %v1908_v62 = vmax.f32 %v1778_v58, 0.0  ;;  %v2670_v58 = vld [vmem:[%s4197_s1 + $0xb0] sm:$0xff] }
 0x5a6   : > { %v1782_v41 = vpop.f32.mrb[112].mxu0  ;;  %2529 = vmatpush1.bf16.xpose.msra.mxu0 %v2528_v46 }
 0x5a7   : > { %v3956_v20 = vpack.c.bf16 %v1908_v62, %v1907_v22  ;;  %v1783_v2 = vadd.f32 %v1782_v41, %v3772_v7  ;;  %v1784_v4 = vpop.f32.mrb[113].mxu0  ;;  %2531 = vmatprep.subr.bf16.mxu0 %v2530_v42  ;;  %v2672_v22 = vld [vmem:[%s4197_s1 + $0xd8] sm:$0xff]  ;;  %v2673_v42 = vld [vmem:[%s4197_s1 + $0xc0] sm:$0xff] }
 0x5a8   : > { %v2538_v62 = vpack.c.bf16 %v2672_v22, %v2671_v61  ;;  %v2681_v61 = vld [vmem:[%s4197_s1 + $0x100] sm:$0xff]  ;;  %v2682_v22 = vld [vmem:[%s4197_s1 + $0x110] sm:$0xff] }
 0x5a9   : > { %v1909_v1 = vmax.f32 %v1783_v2, 0.0 }
 0x5aa   : > { %v1787_v7 = vpop.f32.mrb[114].mxu0 }
 0x5ab   : > { %v1788_v5 = vadd.f32 %v1787_v7, %v3774_v17  ;;  %v1789_v21 = vpop.f32.mrb[115].mxu0  ;;  %v2532_v17 = vpack.c.bf16 %v2666_v36, %v2665_v38  ;;  %v2674_v7 = vld [vmem:[%s4197_s1 + $0xd0] sm:$0xff] }
 0x5ac   : > { %v2676_v21 = vld [vmem:[%s4197_s1 + $0xf8] sm:$0xff] }
 0x5ad   : > { %v1910_v40 = vmax.f32 %v1788_v5, 0.0  ;;  %v2675_v5 = vld [vmem:[%s4197_s1 + $0xe8] sm:$0xff] }
 0x5ae   : > { %v1792_v14 = vpop.f32.mrb[116].mxu0  ;;  %2533 = vmatpush1.bf16.xpose.msra.mxu0 %v2532_v17 }
 0x5af   : > { %v3972_v12 = vpack.c.bf16 %v1910_v40, %v1909_v1  ;;  %v1793_v24 = vadd.f32 %v1792_v14, %v3777_v26  ;;  %v1794_v8 = vpop.f32.mrb[117].mxu0  ;;  %2535 = vmatprep.subr.bf16.mxu0 %v2534_v27  ;;  %v2542_v1 = vpack.c.bf16 %v2676_v21, %v2675_v5  ;;  %v2678_v27 = vld [vmem:[%s4197_s1 + $0xf0] sm:$0xff]  ;;  %v2688_v21 = vld [vmem:[%s4197_s1 + $0x158] sm:$0xff] }
 0x5b1   : > { %v1911_v30 = vmax.f32 %v1793_v24, 0.0 }
 0x5b2   : > { %v1797_v26 = vpop.f32.mrb[118].mxu0 }
 0x5b3   : > { %v1798_v25 = vadd.f32 %v1797_v26, %v3779_v10  ;;  %v1799_v31 = vpop.f32.mrb[119].mxu0  ;;  %v2536_v10 = vpack.c.bf16 %v2670_v58, %v2669_v3  ;;  %v2679_v26 = vld [vmem:[%s4197_s1 + $0x108] sm:$0xff] }
 0x5b5   : > { %v1912_v16 = vmax.f32 %v1798_v25, 0.0  ;;  %v2680_v25 = vld [vmem:[%s4197_s1 + $0x118] sm:$0xff] }
 0x5b6   : > { %v1802_v23 = vpop.f32.mrb[120].mxu0  ;;  %2537 = vmatpush1.bf16.xpose.msra.mxu0 %v2536_v10  ;;  %v2546_v31 = vpack.c.bf16 %v2680_v25, %v2679_v26 }
 0x5b7   : > { %v3988_v15 = vpack.c.bf16 %v1912_v16, %v1911_v30  ;;  %v1803_v44 = vadd.f32 %v1802_v23, %v3782_v32  ;;  %v1804_v55 = vpop.f32.mrb[121].mxu0  ;;  %2539 = vmatprep.subr.bf16.mxu0 %v2538_v62  ;;  %v2548_v62 = vpack.c.bf16 %v2682_v22, %v2681_v61 }
 0x5b9   : > { %v1913_v4 = vmax.f32 %v1803_v44, 0.0 }
 0x5ba   : > { %v1807_v32 = vpop.f32.mrb[122].mxu0 }
 0x5bb   : > { %v1808_v41 = vadd.f32 %v1807_v32, %v3784_v53  ;;  %v1809_v2 = vpop.f32.mrb[123].mxu0  ;;  %v2540_v53 = vpack.c.bf16 %v2674_v7, %v2673_v42  ;;  %v2684_v32 = vld [vmem:[%s4197_s1 + $0x138] sm:$0xff] }
 0x5bd   : > { %v1914_v9 = vmax.f32 %v1808_v41, 0.0 }
 0x5be   : > { %v1812_v28 = vpop.f32.mrb[124].mxu0  ;;  %2541 = vmatpush1.bf16.xpose.msra.mxu0 %v2540_v53  ;;  %v2685_v53 = vld [vmem:[%s4197_s1 + $0x120] sm:$0xff] }
 0x5bf   : > { %v4004_v46 = vpack.c.bf16 %v1914_v9, %v1913_v4  ;;  %v1813_v45 = vadd.f32 %v1812_v28, %v3787_v37  ;;  %v1814_v59 = vpop.f32.mrb[125].mxu0  ;;  %2543 = vmatprep.subr.bf16.mxu0 %v2542_v1 }
 0x5c1   : > { %v1915_v24 = vmax.f32 %v1813_v45, 0.0 }
 0x5c2   : > { %v1817_v37 = vpop.f32.mrb[126].mxu0 }
 0x5c3   : > { %v1818_v40 = vadd.f32 %v1817_v37, %v3789_v34  ;;  %v1819_v14 = vpop.f32.mrb[127].mxu0  ;;  %v2544_v34 = vpack.c.bf16 %v2678_v27, %v2677_v19  ;;  %v2689_v19 = vld [vmem:[%s4197_s1 + $0x140] sm:$0xff] }
 0x5c5   : > { %v1916_v8 = vmax.f32 %v1818_v40, 0.0 }
 0x5c6   : > { %v1822_v38 = vpop.f32.mrb[128].mxu0  ;;  %2545 = vmatpush1.bf16.xpose.msra.mxu0 %v2544_v34  ;;  %v2692_v34 = vld [vmem:[%s4197_s1 + $0x178] sm:$0xff] }
 0x5c7   : > { %v4020_v36 = vpack.c.bf16 %v1916_v8, %v1915_v24  ;;  %v1823_v17 = vadd.f32 %v1822_v38, %v3792_v57  ;;  %v1824_v50 = vpop.f32.mrb[129].mxu0  ;;  %2547 = vmatprep.subr.bf16.mxu0 %v2546_v31 }
 0x5c9   : > { %v1917_v23 = vmax.f32 %v1823_v17, 0.0 }
 0x5ca   : > { %v1827_v57 = vpop.f32.mrb[130].mxu0 }
 0x5cb   : > { %v1828_v30 = vadd.f32 %v1827_v57, %v3794_v51  ;;  %v1829_v16 = vpop.f32.mrb[131].mxu0  ;;  %v2683_v51 = vld [vmem:[%s4197_s1 + $0x128] sm:$0xff] }
 0x5cd   : > { %v1918_v44 = vmax.f32 %v1828_v30, 0.0 }
 0x5ce   : > { %v1832_v55 = vpop.f32.mrb[132].mxu0  ;;  %2549 = vmatpush1.bf16.xpose.msra.mxu0 %v2548_v62 }
 0x5cf   : > { %v2482_v3 = vpack.c.bf16 %v1918_v44, %v1917_v23  ;;  %v1833_v58 = vadd.f32 %v1832_v55, %v3797_v48  ;;  %v1834_v10 = vpop.f32.mrb[133].mxu0  ;;  %v2550_v48 = vpack.c.bf16 %v2684_v32, %v2683_v51 }
 0x5d0   : > { %v2696_v10 = vld [vmem:[%s4197_s1 + $0x198] sm:$0xff] }
 0x5d1   : > { %2483 = vmatprep.subr.bf16.mxu1 %v2482_v3  ;;  %v1919_v9 = vmax.f32 %v1833_v58, 0.0  ;;  %2551 = vmatprep.subr.bf16.mxu0 %v2550_v48  ;;  %v2693_v3 = vld [vmem:[%s4197_s1 + $0x160] sm:$0xff] }
 0x5d2   : > { %v1837_v41 = vpop.f32.mrb[134].mxu0  ;;  %2485 = vmatpush3.bf16.xpose.msra.mxu1 %v3902_v11  ;;  %v2686_v11 = vld [vmem:[%s4197_s1 + $0x130] sm:$0xff] }
 0x5d3   : > { %v1838_v2 = vadd.f32 %v1837_v41, %v3799_v63  ;;  %v1839_v4 = vpop.f32.mrb[135].mxu0  ;;  %v2552_v5 = vpack.c.bf16 %v2686_v11, %v2685_v53  ;;  %v2687_v63 = vld [vmem:[%s4197_s1 + $0x148] sm:$0xff] }
 0x5d5   : > { %v1920_v28 = vmax.f32 %v1838_v2, 0.0 }
 0x5d6   : > { %v1842_v45 = vpop.f32.mrb[136].mxu0  ;;  %2553 = vmatpush1.bf16.xpose.msra.mxu0 %v2552_v5 }
 0x5d7   : > { %v2486_v59 = vpack.c.bf16 %v1920_v28, %v1919_v9  ;;  %v1843_v42 = vadd.f32 %v1842_v45, %v3802_v35  ;;  %v1844_v7 = vpop.f32.mrb[137].mxu0  ;;  %v2554_v35 = vpack.c.bf16 %v2688_v21, %v2687_v63  ;;  %v2697_v9 = vld [vmem:[%s4197_s1 + $0x180] sm:$0xff]  ;;  %v2700_v45 = vld [vmem:[%s4197_s1 + $0x1b8] sm:$0xff] }
 0x5d9   : > { %2487 = vmatprep.subr.bf16.mxu1 %v2486_v59  ;;  %v1921_v14 = vmax.f32 %v1843_v42, 0.0  ;;  %2555 = vmatprep.subr.bf16.mxu0 %v2554_v35 }
 0x5da   : > { %v1847_v1 = vpop.f32.mrb[138].mxu0  ;;  %2489 = vmatpush3.bf16.xpose.msra.mxu1 %v3924_v18  ;;  %v2690_v18 = vld [vmem:[%s4197_s1 + $0x150] sm:$0xff] }
 0x5db   : > { %v1848_v37 = vadd.f32 %v1847_v1, %v3804_v6  ;;  %v1849_v40 = vpop.f32.mrb[139].mxu0  ;;  %v2556_v27 = vpack.c.bf16 %v2690_v18, %v2689_v19  ;;  %v2691_v6 = vld [vmem:[%s4197_s1 + $0x168] sm:$0xff]  ;;  %v2701_v1 = vld [vmem:[%s4197_s1 + $0x1a0] sm:$0xff] }
 0x5dc   : > { %v2704_v40 = vld [vmem:[%s4197_s1 + $0x1d8] sm:$0xff] }
 0x5dd   : > { %v1922_v24 = vmax.f32 %v1848_v37, 0.0 }
 0x5de   : > { %v1852_v8 = vpop.f32.mrb[140].mxu0  ;;  %2557 = vmatpush1.bf16.xpose.msra.mxu0 %v2556_v27 }
 0x5df   : > { %v2490_v38 = vpack.c.bf16 %v1922_v24, %v1921_v14  ;;  %v1853_v17 = vadd.f32 %v1852_v8, %v3807_v47  ;;  %v1854_v50 = vpop.f32.mrb[141].mxu0  ;;  %v2558_v47 = vpack.c.bf16 %v2692_v34, %v2691_v6  ;;  %v2705_v6 = vld [vmem:[%s4197_s1 + $0x1c0] sm:$0xff] }
 0x5e1   : > { %2491 = vmatprep.subr.bf16.mxu1 %v2490_v38  ;;  %v1923_v57 = vmax.f32 %v1853_v17, 0.0  ;;  %2559 = vmatprep.subr.bf16.mxu0 %v2558_v47  ;;  %v2708_v47 = vld [vmem:[%s4197_s1 + $0x1f8] sm:$0xff] }
 0x5e2   : > { %v1857_v26 = vpop.f32.mrb[142].mxu0  ;;  %2493 = vmatpush3.bf16.xpose.msra.mxu1 %v3940_v54  ;;  %v2694_v54 = vld [vmem:[%s4197_s1 + $0x170] sm:$0xff] }
 0x5e3   : > { %v1858_v25 = vadd.f32 %v1857_v26, %v3809_v0  ;;  %v1859_v31 = vpop.f32.mrb[143].mxu0  ;;  %v2560_v58 = vpack.c.bf16 %v2694_v54, %v2693_v3  ;;  %v2695_v0 = vld [vmem:[%s4197_s1 + $0x188] sm:$0xff]  ;;  %v2845_v3 = vmov 1966171168  }
 0x5e4   : > { %v2086_v54 = vunpack.c.l.s4 %v2845_v3 }
 0x5e5   : > { %v1924_v30 = vmax.f32 %v1858_v25, 0.0 }
 0x5e6   : > { %v1862_v16 = vpop.f32.mrb[144].mxu0  ;;  %2561 = vmatpush1.bf16.xpose.msra.mxu0 %v2560_v58  ;;  %v2088_v58 = vlaneseq }
 0x5e7   : > { %v2494_v23 = vpack.c.bf16 %v1924_v30, %v1923_v57  ;;  %v1863_v44 = vadd.f32 %v1862_v16, %v3812_v49  ;;  %v1864_v55 = vpop.f32.mrb[145].mxu0  ;;  %v2562_v49 = vpack.c.bf16 %v2696_v10, %v2695_v0  ;;  %v2087_v0 = vunpack.c.0.s8 %v2086_v54 }
 0x5e8   : > { %v2089_v10 = vshrl.u32 %v2088_v58, 7  ;;  %vm2102_vm2 = vcmp.lt.s32.totalorder %v2088_v58, 256 }
 0x5e9   : > { %2495 = vmatprep.subr.bf16.mxu1 %v2494_v23  ;;  %v1925_v51 = vmax.f32 %v1863_v44, 0.0  ;;  %2563 = vmatprep.subr.bf16.mxu0 %v2562_v49  ;;  %v2709_v23 = vld [vmem:[%s4197_s1 + $0x1e0] sm:$0xff]  ;;  %v2710_v44 = vld [vmem:[%s4197_s1 + $0x1f0] sm:$0xff] }
 0x5ea   : > { %v1867_v61 = vpop.f32.mrb[146].mxu0  ;;  %2497 = vmatpush3.bf16.xpose.msra.mxu1 %v3956_v20  ;;  %v2698_v20 = vld [vmem:[%s4197_s1 + $0x190] sm:$0xff]  ;;  %v2576_v55 = vpack.c.bf16 %v2710_v44, %v2709_v23 }
 0x5eb   : > { %v1868_v22 = vadd.f32 %v1867_v61, %v3814_v29  ;;  %v1869_v62 = vpop.f32.mrb[147].mxu0  ;;  %v2564_v28 = vpack.c.bf16 %v2698_v20, %v2697_v9  ;;  %v2699_v29 = vld [vmem:[%s4197_s1 + $0x1a8] sm:$0xff] }
 0x5ed   : > { %v1926_v32 = vmax.f32 %v1868_v22, 0.0 }
 0x5ee   : > { %v1872_v48 = vpop.f32.mrb[148].mxu0  ;;  %2565 = vmatpush1.bf16.xpose.msra.mxu0 %v2564_v28 }
 0x5ef   : > { %v2498_v41 = vpack.c.bf16 %v1926_v32, %v1925_v51  ;;  %v1873_v2 = vadd.f32 %v1872_v48, %v3817_v33  ;;  %v1874_v4 = vpop.f32.mrb[149].mxu0  ;;  %v2566_v33 = vpack.c.bf16 %v2700_v45, %v2699_v29 }
 0x5f1   : > { %2499 = vmatprep.subr.bf16.mxu1 %v2498_v41  ;;  %v1927_v53 = vmax.f32 %v1873_v2, 0.0  ;;  %2567 = vmatprep.subr.bf16.mxu0 %v2566_v33 }
 0x5f2   : > { %v1877_v59 = vpop.f32.mrb[150].mxu0  ;;  %2501 = vmatpush3.bf16.xpose.msra.mxu1 %v3972_v12  ;;  %v2702_v12 = vld [vmem:[%s4197_s1 + $0x1b0] sm:$0xff] }
 0x5f3   : > { %v1878_v42 = vadd.f32 %v1877_v59, %v3819_v43  ;;  %v1879_v7 = vpop.f32.mrb[151].mxu0  ;;  %v2568_v37 = vpack.c.bf16 %v2702_v12, %v2701_v1  ;;  %v2703_v43 = vld [vmem:[%s4197_s1 + $0x1c8] sm:$0xff] }
 0x5f5   : > { %v1928_v11 = vmax.f32 %v1878_v42, 0.0 }
 0x5f6   : > { %v1882_v5 = vpop.f32.mrb[152].mxu0  ;;  %2569 = vmatpush1.bf16.xpose.msra.mxu0 %v2568_v37 }
 0x5f7   : > { %v2502_v63 = vpack.c.bf16 %v1928_v11, %v1927_v53  ;;  %v1883_v21 = vadd.f32 %v1882_v5, %v3822_v52  ;;  %v1884_v35 = vpop.f32.mrb[153].mxu0  ;;  %v2570_v52 = vpack.c.bf16 %v2704_v40, %v2703_v43 }
 0x5f9   : > { %2503 = vmatprep.subr.bf16.mxu1 %v2502_v63  ;;  %v1929_v38 = vmax.f32 %v1883_v21, 0.0  ;;  %2571 = vmatprep.subr.bf16.mxu0 %v2570_v52 }
 0x5fa   : > { %v1887_v14 = vpop.f32.mrb[154].mxu0  ;;  %2505 = vmatpush3.bf16.xpose.msra.mxu1 %v3988_v15  ;;  %v2706_v15 = vld [vmem:[%s4197_s1 + $0x1d0] sm:$0xff] }
 0x5fb   : > { %v1888_v24 = vadd.f32 %v1887_v14, %v3824_v39  ;;  %v1889_v8 = vpop.f32.mrb[155].mxu0  ;;  %v2572_v34 = vpack.c.bf16 %v2706_v15, %v2705_v6  ;;  %v2707_v39 = vld [vmem:[%s4197_s1 + $0x1e8] sm:$0xff] }
 0x5fd   : > { %v1930_v17 = vmax.f32 %v1888_v24, 0.0 }
 0x5fe   : > { %v1892_v50 = vpop.f32.mrb[156].mxu0  ;;  %2573 = vmatpush1.bf16.xpose.msra.mxu0 %v2572_v34 }
 0x5ff   : > { %v2506_v19 = vpack.c.bf16 %v1930_v17, %v1929_v38  ;;  %v1893_v18 = vadd.f32 %v1892_v50, %v3827_v60  ;;  %v1894_v27 = vpop.f32.mrb[157].mxu0  ;;  %v2574_v60 = vpack.c.bf16 %v2708_v47, %v2707_v39 }
 0x601   : > { %2507 = vmatprep.subr.bf16.mxu1 %v2506_v19  ;;  %v1931_v57 = vmax.f32 %v1893_v18, 0.0  ;;  %2575 = vmatprep.subr.bf16.mxu0 %v2574_v60 }
 0x602   : > { %v1897_v26 = vpop.f32.mrb[158].mxu0  ;;  %2509 = vmatpush3.bf16.xpose.msra.mxu1 %v4004_v46 }
 0x603   : > { %v1898_v25 = vadd.f32 %v1897_v26, %v3829_v13  ;;  %v1899_v31 = vpop.f32.mrb[159].mxu0 }
 0x605   : > { %v1932_v30 = vmax.f32 %v1898_v25, 0.0 }
 0x606   : > { %2577 = vmatpush1.bf16.xpose.msra.mxu0 %v2576_v55 }
 0x607   : > { %v2510_v16 = vpack.c.bf16 %v1932_v30, %v1931_v57 }
 0x609   : > { %2511 = vmatprep.subr.bf16.mxu1 %v2510_v16 }
 0x60a   : > { %2513 = vmatpush3.bf16.xpose.msra.mxu1 %v4020_v36 }
 0x611   : > { %2285 = vmatmul.mubr.f32.vlgmr.msra.gmra.mrb[160].mxu1 %v3898_v56  ;;  %v2090_v56 = vsub.s32 %v2087_v0, %v2089_v10 }
 0x6e4   : > { %v2000_v13 = vpop.f32.mrb[160].mxu1 }
 0x6e5   : > { %v2002_v46 = vpop.f32.mrb[161].mxu1  ;;  %v2007_v49 = vrot.slane %v2000_v13, 1 }
 0x6e6   : > { %2075 = vmatprep.mubr.f32.mxu0 %v2002_v46  ;;  %v2008_v61 = vrot.slane %v2002_v46, 1 }
 0x6e7   : > { %2076 = vmatmul.mubr.f32.vlgmr.msra.gmra.mrb[160].mxu0 %v2000_v13 }
 0x7ba   : > { %v2077_v22 = vpop.f32.mrb[160].mxu0 }
 0x7bb   : > { %v2078_v62 = vadd.f32 %v2077_v22, %v2007_v49  ;;  %v2079_v36 = vpop.f32.mrb[161].mxu0 }
 0x7bc   : > { %v2080_v51 = vadd.f32 %v2079_v36, %v2008_v61 }
 0x7be   : > { %v2084_v32 = vcombine.low %v2078_v62, %v2080_v51 }
 0x7c0   : > { %v2091_v48 = vrot.slane %v2084_v32, %v2090_v56 }
 0x7c2   : > { %v2098_v41 = vrot.slane %v2091_v48, %v2090_v56 }
 0x7c4   : > { %2104 = vst.msk [vmem:[%s275_s18] sm:$0x3] %vm2102_vm2, %v2098_v41 }
 0x7c5   : > { %2780 = shalt.err (!%p2777_p11)
}
 0x7c6   : > { %s2781_s12 = scalar_lea.hbm %s4154_s28, 32  ;;  %s2785_s16 = scalar_lea.hbm %s4202_s6, 64 }
 0x7c7   : > { %p2782_p13 = scmp.ne.s32.totalorder %s4154_s28, %s2781_s12  ;;  %p2786_p6 = scmp.lt.u32.totalorder %s4154_s28, %s4202_s6 }
 0x7c8   : > { %p2787_p9 = scmp.lt.u32.totalorder %s2785_s16, %s2781_s12  ;;  %p2789_p10 = scmp.lt.u32.totalorder %s2781_s12, %s4154_s28 }
 0x7c9   : > { %p2783_p5 = pnand %p2782_p13, %p4356_p1 }
 0x7ca   : > { %p2788_p12 = por %p2787_p9, %p2786_p6 }
 0x7cb   : > { %p2784_p0 = pneg %p2783_p5 }
 0x7cc   : > { %p2790_p2 = por %p2789_p10, %p2788_p12 }
 0x7ce   : > { %p2791_p3 = pnand %p2790_p2, %p2784_p0 }
 0x7d0   : > { %2794 = shalt.err (!%p2791_p3)
}
 0x7d1   : > { %2590 = dma.vmem_to_hbm [thread:$0]  (%p4356_p1), %s4156_s19, 32, %s4154_s28, %s2106_s11  }
 0x7d2 PF: > { %p2607_p4 = scmp.ge.s32.totalorder %s2837_s24, 2  ;;  %s2132_s18 = sand.u32 1, %s2825_s21  }
 0x7d3   : > { %p4357_p7 = scmp.ne.s32.totalorder %s4256_s8, 0  ;;  %s2133_s20 = scalar_lea.sflag [#allocation4], %s2132_s18 }
 0x7d5   : > { %p2600_p8 = pnand %p2607_p4, %p4357_p7 }
 0x7d7   : > { %2820 = dma.done.wait (!%p2600_p8), %s2133_s20, 32  }
 0x7d8   : > { %2822 = vsyncadd (!%p2600_p8), %s2133_s20, 4294967264  ;;  %p18_p11 = scmp.ge.s32.totalorder %s2907_s27, 4   ;;  %s4358_s21 = smov %s2829_s22 }
 0x7d9   : > { %s4359_s22 = smov %s2833_s23  ;;  %s4360_s23 = smov %s2918_s30 }
 0x7da   : > { %s4361_s24 = smov %s2907_s27  ;;  %20 = sbr.rel (!%p18_p11) target bundleno = 5 (0x5), region = 88 }
 0x7e1   :  { %2138 = vsyncpa [#allocation3], 1 }
 0x7e2   :  { %2140 = vsyncpa [#allocation3 + $0x1], 1 }
 0x7e3   :  { %2141 = vsyncpa [#allocation6], 1 }
 0x7e4   :  { %2142 = vsyncpa [#allocation4], 1 }
 0x7e5   :  { %2144 = vsyncpa [#allocation4 + $0x1], 1 }

</bundles_post_ra>
